<compile_context>
chip_gen: v5e
topology: v5e:2x2
jax: 0.10.0
libtpu: 0.0.40
codegen_flags: <defaults>
</compile_context>

<pallas_src>
import functools

import jax
import jax.numpy as jnp
import numpy as np
from jax.experimental import pallas as pl
from jax.experimental.pallas import tpu as pltpu


def _generator_kernel(x_ref, len_ref, wih_ref, whh_ref, b_ref,
                      wfc_ref, bfc_ref, hinit_ref, cinit_ref,
                      out_ref, hseq_sc, *, seq_len, hidden_dim):
    B, T, D_in = x_ref.shape
    H = hidden_dim
    O = out_ref.shape[-1]

    # ---- Phase 1: input projection for every timestep in ONE MXU op ---------
    #   gates_x[b*T + t, :] = x[b, t, :] @ W_ih^T + (b_ih + b_hh)
    x_flat = x_ref[...].reshape(B * T, D_in)
    gates_x = (jnp.dot(x_flat, wih_ref[...],
                       preferred_element_type=jnp.float32) + b_ref[...])
    gates_x = gates_x.reshape(B, T, 4 * H)

    lengths = len_ref[...]                                  # (B, 1) int32
    whh = whh_ref[...]                                      # (H, 4H), loaded once
    h = jnp.broadcast_to(hinit_ref[...], (B, H))
    c = jnp.broadcast_to(cinit_ref[...], (B, H))

    # ---- Phase 2: serial recurrence (only h @ W_hh on the dependency chain) -
    for t in range(seq_len):
        gates = gates_x[:, t, :] + jnp.dot(h, whh,
                                           preferred_element_type=jnp.float32)
        sig = jax.nn.sigmoid(gates)     # one full-lane-width (B, 4H) EUP pass
        tnh = jnp.tanh(gates)           # one full-lane-width (B, 4H) EUP pass
        i_g = sig[:, 0 * H:1 * H]
        f_g = sig[:, 1 * H:2 * H]
        g_g = tnh[:, 2 * H:3 * H]
        o_g = sig[:, 3 * H:4 * H]
        c_new = f_g * c + i_g * g_g
        h_new = o_g * jnp.tanh(c_new)

        valid = t < lengths                                 # (B, 1) bool mask
        h = jnp.where(valid, h_new, h)                      # freeze past length
        c = jnp.where(valid, c_new, c)
        # pad_packed_sequence: padded positions carry exactly-zero hidden states
        hseq_sc[:, t, :] = jnp.where(valid, h_new, 0.0)

    # ---- Phase 3: dropout (eval = identity) + fc as ONE batched matmul ------
    # Padded rows are zero, so their outputs equal b_fc — same as the PyTorch
    # model applying fc after pad_packed_sequence.
    y = (jnp.dot(hseq_sc[...].reshape(B * T, H), wfc_ref[...],
                 preferred_element_type=jnp.float32) + bfc_ref[...])
    out_ref[...] = y.reshape(B, T, O).astype(out_ref.dtype)


def generator_forward(inputs, lengths, params):
    """inputs: (B, T, input_dim) f32 (batch_first), lengths: (B,) int32."""
    B, T, D_in = inputs.shape
    H = params["w_hh_t"].shape[0]
    O = params["w_fc_t"].shape[1]

    len_col = lengths.astype(jnp.int32).reshape(B, 1)
    kernel = functools.partial(_generator_kernel, seq_len=T, hidden_dim=H)

    # Single invocation, no grid: every operand is small enough to live whole in
    # VMEM; all time iteration happens inside the kernel.
    return pl.pallas_call(
        kernel,
        out_shape=jax.ShapeDtypeStruct((B, T, O), jnp.float32),
        scratch_shapes=[pltpu.VMEM((B, T, H), jnp.float32)],   # masked h_t per step
    )(inputs, len_col, params["w_ih_t"], params["w_hh_t"], params["b_gates"],
      params["w_fc_t"], params["b_fc"], params["h_init"], params["c_init"])


def init_params(key, input_dim, hidden_dim, output_dim):
    k1, k2, k3, k4 = jax.random.split(key, 4)
    # LSTM weights ~ N(0, 0.02), LSTM biases = 0 (Generator.initialize())
    w_ih = 0.02 * jax.random.normal(k1, (4 * hidden_dim, input_dim), jnp.float32)
    w_hh = 0.02 * jax.random.normal(k2, (4 * hidden_dim, hidden_dim), jnp.float32)
    b_ih = jnp.zeros((4 * hidden_dim,), jnp.float32)
    b_hh = jnp.zeros((4 * hidden_dim,), jnp.float32)
    # fc: Linear(hidden_dim, output_dim); synthetic init with a NONZERO bias so
    # the pad_packed_sequence -> fc semantics (padded outputs == b_fc) is tested.
    w_fc = 0.02 * jax.random.normal(k3, (output_dim, hidden_dim), jnp.float32)
    b_fc = 0.02 * jax.random.normal(k4, (output_dim,), jnp.float32)
    return {
        "w_ih_t": w_ih.T,                               # (input_dim, 4H)
        "w_hh_t": w_hh.T,                               # (H, 4H)
        "b_gates": (b_ih + b_hh).reshape(1, -1),        # (1, 4H)
        "w_fc_t": w_fc.T,                               # (H, O)
        "b_fc": b_fc.reshape(1, -1),                    # (1, O)
        "h_init": jnp.zeros((1, hidden_dim), jnp.float32),
        "c_init": jnp.zeros((1, hidden_dim), jnp.float32),
    }


def reference_forward(inputs, lengths, params):
    """Pure-JAX reference of the PyTorch forward (eval mode)."""
    B, T, _ = inputs.shape
    H = params["w_hh_t"].shape[0]
    h = jnp.broadcast_to(params["h_init"], (B, H))
    c = jnp.broadcast_to(params["c_init"], (B, H))
    hs = []
    for t in range(T):
        x_t = inputs[:, t, :]
        gates = x_t @ params["w_ih_t"] + h @ params["w_hh_t"] + params["b_gates"]
        i = jax.nn.sigmoid(gates[:, 0 * H:1 * H])
        f = jax.nn.sigmoid(gates[:, 1 * H:2 * H])
        g = jnp.tanh(gates[:, 2 * H:3 * H])
        o = jax.nn.sigmoid(gates[:, 3 * H:4 * H])
        c_new = f * c + i * g
        h_new = o * jnp.tanh(c_new)
        valid = (t < lengths)[:, None]
        h = jnp.where(valid, h_new, h)
        c = jnp.where(valid, c_new, c)
        hs.append(jnp.where(valid, h_new, 0.0))         # pad_packed_sequence zeros
    h_seq = jnp.stack(hs, axis=1)                       # (B, T, H)
    y = h_seq.reshape(B * T, H) @ params["w_fc_t"] + params["b_fc"]
    return y.reshape(B, T, -1)


if __name__ == "__main__":
    # Small shapes consistent with the module's forward:
    # batch=2, seq=8, input_dim=16, hidden_dim=32, output_dim=8.
    B, T, D_IN, H, O = 2, 8, 16, 32, 8

    key = jax.random.PRNGKey(0)
    k_in, k_par = jax.random.split(key)
    inputs = jax.random.normal(k_in, (B, T, D_IN), jnp.float32)
    lengths = jnp.array([8, 5], dtype=jnp.int32)   # sorted desc (pack_padded_sequence)
    params = init_params(k_par, D_IN, H, O)

    out = generator_forward(inputs, lengths, params)
    out = jax.block_until_ready(out)

    ref = reference_forward(inputs, lengths, params)
    np.testing.assert_allclose(np.asarray(out), np.asarray(ref), rtol=1e-5, atol=1e-5)
    assert out.shape == (B, T, O)

    print("KERNEL_OK")
</pallas_src>

<mosaic_0001>
module attributes {stable_mosaic.version = 11 : i64} {
  func.func @_generator_kernel(%arg0: memref<2x8x16xf32, #tpu.memory_space<vmem>>, %arg1: memref<2x1xi32, #tpu.memory_space<vmem>>, %arg2: memref<16x128xf32, #tpu.memory_space<vmem>>, %arg3: memref<32x128xf32, #tpu.memory_space<vmem>>, %arg4: memref<1x128xf32, #tpu.memory_space<vmem>>, %arg5: memref<32x8xf32, #tpu.memory_space<vmem>>, %arg6: memref<1x8xf32, #tpu.memory_space<vmem>>, %arg7: memref<1x32xf32, #tpu.memory_space<vmem>>, %arg8: memref<1x32xf32, #tpu.memory_space<vmem>>, %arg9: memref<2x8x8xf32, #tpu.memory_space<vmem>>, %arg10: memref<2x8x32xf32, #tpu.memory_space<vmem>>) attributes {dimension_semantics = [], scalar_prefetch = 0 : i64, scratch_operands = 1 : i64, tpu.core_type = #tpu.core_type<tc>} {
    %c0 = arith.constant 0 : index
    %c0_0 = arith.constant 0 : index
    %c0_1 = arith.constant 0 : index
    %0 = vector.load %arg0[%c0, %c0_0, %c0_1] : memref<2x8x16xf32, #tpu.memory_space<vmem>>, vector<2x8x16xf32>
    %1 = vector.shape_cast %0 : vector<2x8x16xf32> to vector<16x16xf32>
    %c0_2 = arith.constant 0 : index
    %c0_3 = arith.constant 0 : index
    %2 = vector.load %arg2[%c0_2, %c0_3] : memref<16x128xf32, #tpu.memory_space<vmem>>, vector<16x128xf32>
    %cst = arith.constant dense<0.000000e+00> : vector<16x128xf32>
    %3 = tpu.matmul %1, %2, %cst {dimension_numbers = #tpu.dot_dimension_numbers<[1], [0], [0], [1], [0, 0, 1, 1], [], []>} : vector<16x16xf32>, vector<16x128xf32>, vector<16x128xf32> -> vector<16x128xf32>
    %c0_4 = arith.constant 0 : index
    %c0_5 = arith.constant 0 : index
    %4 = vector.load %arg4[%c0_4, %c0_5] : memref<1x128xf32, #tpu.memory_space<vmem>>, vector<1x128xf32>
    %5 = vector.broadcast %4 : vector<1x128xf32> to vector<16x128xf32>
    %6 = arith.addf %3, %5 : vector<16x128xf32>
    %7 = vector.shape_cast %6 : vector<16x128xf32> to vector<2x8x128xf32>
    %c0_6 = arith.constant 0 : index
    %c0_7 = arith.constant 0 : index
    %8 = vector.load %arg1[%c0_6, %c0_7] : memref<2x1xi32, #tpu.memory_space<vmem>>, vector<2x1xi32>
    %c0_8 = arith.constant 0 : index
    %c0_9 = arith.constant 0 : index
    %9 = vector.load %arg3[%c0_8, %c0_9] : memref<32x128xf32, #tpu.memory_space<vmem>>, vector<32x128xf32>
    %c0_10 = arith.constant 0 : index
    %c0_11 = arith.constant 0 : index
    %10 = vector.load %arg7[%c0_10, %c0_11] : memref<1x32xf32, #tpu.memory_space<vmem>>, vector<1x32xf32>
    %11 = vector.shape_cast %10 : vector<1x32xf32> to vector<1x32xf32>
    %12 = vector.broadcast %11 : vector<1x32xf32> to vector<2x32xf32>
    %c0_12 = arith.constant 0 : index
    %c0_13 = arith.constant 0 : index
    %13 = vector.load %arg8[%c0_12, %c0_13] : memref<1x32xf32, #tpu.memory_space<vmem>>, vector<1x32xf32>
    %14 = vector.shape_cast %13 : vector<1x32xf32> to vector<1x32xf32>
    %15 = vector.broadcast %14 : vector<1x32xf32> to vector<2x32xf32>
    %16 = vector.extract_strided_slice %7 {offsets = [0, 0, 0], sizes = [2, 1, 128], strides = [1, 1, 1]} : vector<2x8x128xf32> to vector<2x1x128xf32>
    %17 = vector.shape_cast %16 : vector<2x1x128xf32> to vector<2x128xf32>
    %cst_14 = arith.constant dense<0.000000e+00> : vector<2x128xf32>
    %18 = tpu.matmul %12, %9, %cst_14 {dimension_numbers = #tpu.dot_dimension_numbers<[1], [0], [0], [1], [0, 0, 1, 1], [], []>} : vector<2x32xf32>, vector<32x128xf32>, vector<2x128xf32> -> vector<2x128xf32>
    %19 = arith.addf %17, %18 : vector<2x128xf32>
    %20 = arith.negf %19 : vector<2x128xf32>
    %21 = math.exp %20 : vector<2x128xf32>
    %cst_15 = arith.constant 1.000000e+00 : f32
    %22 = vector.broadcast %cst_15 : f32 to vector<2x128xf32>
    %23 = arith.addf %22, %21 : vector<2x128xf32>
    %24 = arith.divf %22, %23 : vector<2x128xf32>
    %25 = math.tanh %19 : vector<2x128xf32>
    %26 = vector.extract_strided_slice %24 {offsets = [0, 0], sizes = [2, 32], strides = [1, 1]} : vector<2x128xf32> to vector<2x32xf32>
    %27 = vector.extract_strided_slice %24 {offsets = [0, 32], sizes = [2, 32], strides = [1, 1]} : vector<2x128xf32> to vector<2x32xf32>
    %28 = vector.extract_strided_slice %25 {offsets = [0, 64], sizes = [2, 32], strides = [1, 1]} : vector<2x128xf32> to vector<2x32xf32>
    %29 = vector.extract_strided_slice %24 {offsets = [0, 96], sizes = [2, 32], strides = [1, 1]} : vector<2x128xf32> to vector<2x32xf32>
    %30 = arith.mulf %27, %15 : vector<2x32xf32>
    %31 = arith.mulf %26, %28 : vector<2x32xf32>
    %32 = arith.addf %30, %31 : vector<2x32xf32>
    %33 = math.tanh %32 : vector<2x32xf32>
    %34 = arith.mulf %29, %33 : vector<2x32xf32>
    %c0_i32 = arith.constant 0 : i32
    %35 = vector.broadcast %c0_i32 : i32 to vector<2x1xi32>
    %36 = arith.cmpi sgt, %8, %35 : vector<2x1xi32>
    %37 = vector.shape_cast %36 : vector<2x1xi1> to vector<2x1xi1>
    %38 = vector.broadcast %37 : vector<2x1xi1> to vector<2x32xi1>
    %39 = arith.select %38, %34, %12 : vector<2x32xi1>, vector<2x32xf32>
    %40 = vector.shape_cast %36 : vector<2x1xi1> to vector<2x1xi1>
    %41 = vector.broadcast %40 : vector<2x1xi1> to vector<2x32xi1>
    %42 = arith.select %41, %32, %15 : vector<2x32xi1>, vector<2x32xf32>
    %cst_16 = arith.constant 0.000000e+00 : f32
    %43 = vector.shape_cast %36 : vector<2x1xi1> to vector<2x1xi1>
    %44 = vector.broadcast %43 : vector<2x1xi1> to vector<2x32xi1>
    %45 = vector.broadcast %cst_16 : f32 to vector<2x32xf32>
    %46 = arith.select %44, %34, %45 : vector<2x32xi1>, vector<2x32xf32>
    %c0_17 = arith.constant 0 : index
    %c0_18 = arith.constant 0 : index
    %c0_19 = arith.constant 0 : index
    %47 = vector.load %arg10[%c0_17, %c0_18, %c0_19] : memref<2x8x32xf32, #tpu.memory_space<vmem>>, vector<2x1x32xf32>
    %48 = vector.shape_cast %47 : vector<2x1x32xf32> to vector<2x32xf32>
    %49 = vector.shape_cast %46 : vector<2x32xf32> to vector<2x1x32xf32>
    tpu.vector_store %arg10[%c0_17, %c0_18, %c0_19], %49 {strides = array<i32>} : memref<2x8x32xf32, #tpu.memory_space<vmem>>, vector<2x1x32xf32>,
    %50 = vector.extract_strided_slice %7 {offsets = [0, 1, 0], sizes = [2, 1, 128], strides = [1, 1, 1]} : vector<2x8x128xf32> to vector<2x1x128xf32>
    %51 = vector.shape_cast %50 : vector<2x1x128xf32> to vector<2x128xf32>
    %cst_20 = arith.constant dense<0.000000e+00> : vector<2x128xf32>
    %52 = tpu.matmul %39, %9, %cst_20 {dimension_numbers = #tpu.dot_dimension_numbers<[1], [0], [0], [1], [0, 0, 1, 1], [], []>} : vector<2x32xf32>, vector<32x128xf32>, vector<2x128xf32> -> vector<2x128xf32>
    %53 = arith.addf %51, %52 : vector<2x128xf32>
    %54 = arith.negf %53 : vector<2x128xf32>
    %55 = math.exp %54 : vector<2x128xf32>
    %cst_21 = arith.constant 1.000000e+00 : f32
    %56 = vector.broadcast %cst_21 : f32 to vector<2x128xf32>
    %57 = arith.addf %56, %55 : vector<2x128xf32>
    %58 = arith.divf %56, %57 : vector<2x128xf32>
    %59 = math.tanh %53 : vector<2x128xf32>
    %60 = vector.extract_strided_slice %58 {offsets = [0, 0], sizes = [2, 32], strides = [1, 1]} : vector<2x128xf32> to vector<2x32xf32>
    %61 = vector.extract_strided_slice %58 {offsets = [0, 32], sizes = [2, 32], strides = [1, 1]} : vector<2x128xf32> to vector<2x32xf32>
    %62 = vector.extract_strided_slice %59 {offsets = [0, 64], sizes = [2, 32], strides = [1, 1]} : vector<2x128xf32> to vector<2x32xf32>
    %63 = vector.extract_strided_slice %58 {offsets = [0, 96], sizes = [2, 32], strides = [1, 1]} : vector<2x128xf32> to vector<2x32xf32>
    %64 = arith.mulf %61, %42 : vector<2x32xf32>
    %65 = arith.mulf %60, %62 : vector<2x32xf32>
    %66 = arith.addf %64, %65 : vector<2x32xf32>
    %67 = math.tanh %66 : vector<2x32xf32>
    %68 = arith.mulf %63, %67 : vector<2x32xf32>
    %c1_i32 = arith.constant 1 : i32
    %69 = vector.broadcast %c1_i32 : i32 to vector<2x1xi32>
    %70 = arith.cmpi sgt, %8, %69 : vector<2x1xi32>
    %71 = vector.shape_cast %70 : vector<2x1xi1> to vector<2x1xi1>
    %72 = vector.broadcast %71 : vector<2x1xi1> to vector<2x32xi1>
    %73 = arith.select %72, %68, %39 : vector<2x32xi1>, vector<2x32xf32>
    %74 = vector.shape_cast %70 : vector<2x1xi1> to vector<2x1xi1>
    %75 = vector.broadcast %74 : vector<2x1xi1> to vector<2x32xi1>
    %76 = arith.select %75, %66, %42 : vector<2x32xi1>, vector<2x32xf32>
    %cst_22 = arith.constant 0.000000e+00 : f32
    %77 = vector.shape_cast %70 : vector<2x1xi1> to vector<2x1xi1>
    %78 = vector.broadcast %77 : vector<2x1xi1> to vector<2x32xi1>
    %79 = vector.broadcast %cst_22 : f32 to vector<2x32xf32>
    %80 = arith.select %78, %68, %79 : vector<2x32xi1>, vector<2x32xf32>
    %c0_23 = arith.constant 0 : index
    %c1 = arith.constant 1 : index
    %c0_24 = arith.constant 0 : index
    %81 = vector.load %arg10[%c0_23, %c1, %c0_24] : memref<2x8x32xf32, #tpu.memory_space<vmem>>, vector<2x1x32xf32>
    %82 = vector.shape_cast %81 : vector<2x1x32xf32> to vector<2x32xf32>
    %83 = vector.shape_cast %80 : vector<2x32xf32> to vector<2x1x32xf32>
    tpu.vector_store %arg10[%c0_23, %c1, %c0_24], %83 {strides = array<i32>} : memref<2x8x32xf32, #tpu.memory_space<vmem>>, vector<2x1x32xf32>,
    %84 = vector.extract_strided_slice %7 {offsets = [0, 2, 0], sizes = [2, 1, 128], strides = [1, 1, 1]} : vector<2x8x128xf32> to vector<2x1x128xf32>
    %85 = vector.shape_cast %84 : vector<2x1x128xf32> to vector<2x128xf32>
    %cst_25 = arith.constant dense<0.000000e+00> : vector<2x128xf32>
    %86 = tpu.matmul %73, %9, %cst_25 {dimension_numbers = #tpu.dot_dimension_numbers<[1], [0], [0], [1], [0, 0, 1, 1], [], []>} : vector<2x32xf32>, vector<32x128xf32>, vector<2x128xf32> -> vector<2x128xf32>
    %87 = arith.addf %85, %86 : vector<2x128xf32>
    %88 = arith.negf %87 : vector<2x128xf32>
    %89 = math.exp %88 : vector<2x128xf32>
    %cst_26 = arith.constant 1.000000e+00 : f32
    %90 = vector.broadcast %cst_26 : f32 to vector<2x128xf32>
    %91 = arith.addf %90, %89 : vector<2x128xf32>
    %92 = arith.divf %90, %91 : vector<2x128xf32>
    %93 = math.tanh %87 : vector<2x128xf32>
    %94 = vector.extract_strided_slice %92 {offsets = [0, 0], sizes = [2, 32], strides = [1, 1]} : vector<2x128xf32> to vector<2x32xf32>
    %95 = vector.extract_strided_slice %92 {offsets = [0, 32], sizes = [2, 32], strides = [1, 1]} : vector<2x128xf32> to vector<2x32xf32>
    %96 = vector.extract_strided_slice %93 {offsets = [0, 64], sizes = [2, 32], strides = [1, 1]} : vector<2x128xf32> to vector<2x32xf32>
    %97 = vector.extract_strided_slice %92 {offsets = [0, 96], sizes = [2, 32], strides = [1, 1]} : vector<2x128xf32> to vector<2x32xf32>
    %98 = arith.mulf %95, %76 : vector<2x32xf32>
    %99 = arith.mulf %94, %96 : vector<2x32xf32>
    %100 = arith.addf %98, %99 : vector<2x32xf32>
    %101 = math.tanh %100 : vector<2x32xf32>
    %102 = arith.mulf %97, %101 : vector<2x32xf32>
    %c2_i32 = arith.constant 2 : i32
    %103 = vector.broadcast %c2_i32 : i32 to vector<2x1xi32>
    %104 = arith.cmpi sgt, %8, %103 : vector<2x1xi32>
    %105 = vector.shape_cast %104 : vector<2x1xi1> to vector<2x1xi1>
    %106 = vector.broadcast %105 : vector<2x1xi1> to vector<2x32xi1>
    %107 = arith.select %106, %102, %73 : vector<2x32xi1>, vector<2x32xf32>
    %108 = vector.shape_cast %104 : vector<2x1xi1> to vector<2x1xi1>
    %109 = vector.broadcast %108 : vector<2x1xi1> to vector<2x32xi1>
    %110 = arith.select %109, %100, %76 : vector<2x32xi1>, vector<2x32xf32>
    %cst_27 = arith.constant 0.000000e+00 : f32
    %111 = vector.shape_cast %104 : vector<2x1xi1> to vector<2x1xi1>
    %112 = vector.broadcast %111 : vector<2x1xi1> to vector<2x32xi1>
    %113 = vector.broadcast %cst_27 : f32 to vector<2x32xf32>
    %114 = arith.select %112, %102, %113 : vector<2x32xi1>, vector<2x32xf32>
    %c0_28 = arith.constant 0 : index
    %c2 = arith.constant 2 : index
    %c0_29 = arith.constant 0 : index
    %115 = vector.load %arg10[%c0_28, %c2, %c0_29] : memref<2x8x32xf32, #tpu.memory_space<vmem>>, vector<2x1x32xf32>
    %116 = vector.shape_cast %115 : vector<2x1x32xf32> to vector<2x32xf32>
    %117 = vector.shape_cast %114 : vector<2x32xf32> to vector<2x1x32xf32>
    tpu.vector_store %arg10[%c0_28, %c2, %c0_29], %117 {strides = array<i32>} : memref<2x8x32xf32, #tpu.memory_space<vmem>>, vector<2x1x32xf32>,
    %118 = vector.extract_strided_slice %7 {offsets = [0, 3, 0], sizes = [2, 1, 128], strides = [1, 1, 1]} : vector<2x8x128xf32> to vector<2x1x128xf32>
    %119 = vector.shape_cast %118 : vector<2x1x128xf32> to vector<2x128xf32>
    %cst_30 = arith.constant dense<0.000000e+00> : vector<2x128xf32>
    %120 = tpu.matmul %107, %9, %cst_30 {dimension_numbers = #tpu.dot_dimension_numbers<[1], [0], [0], [1], [0, 0, 1, 1], [], []>} : vector<2x32xf32>, vector<32x128xf32>, vector<2x128xf32> -> vector<2x128xf32>
    %121 = arith.addf %119, %120 : vector<2x128xf32>
    %122 = arith.negf %121 : vector<2x128xf32>
    %123 = math.exp %122 : vector<2x128xf32>
    %cst_31 = arith.constant 1.000000e+00 : f32
    %124 = vector.broadcast %cst_31 : f32 to vector<2x128xf32>
    %125 = arith.addf %124, %123 : vector<2x128xf32>
    %126 = arith.divf %124, %125 : vector<2x128xf32>
    %127 = math.tanh %121 : vector<2x128xf32>
    %128 = vector.extract_strided_slice %126 {offsets = [0, 0], sizes = [2, 32], strides = [1, 1]} : vector<2x128xf32> to vector<2x32xf32>
    %129 = vector.extract_strided_slice %126 {offsets = [0, 32], sizes = [2, 32], strides = [1, 1]} : vector<2x128xf32> to vector<2x32xf32>
    %130 = vector.extract_strided_slice %127 {offsets = [0, 64], sizes = [2, 32], strides = [1, 1]} : vector<2x128xf32> to vector<2x32xf32>
    %131 = vector.extract_strided_slice %126 {offsets = [0, 96], sizes = [2, 32], strides = [1, 1]} : vector<2x128xf32> to vector<2x32xf32>
    %132 = arith.mulf %129, %110 : vector<2x32xf32>
    %133 = arith.mulf %128, %130 : vector<2x32xf32>
    %134 = arith.addf %132, %133 : vector<2x32xf32>
    %135 = math.tanh %134 : vector<2x32xf32>
    %136 = arith.mulf %131, %135 : vector<2x32xf32>
    %c3_i32 = arith.constant 3 : i32
    %137 = vector.broadcast %c3_i32 : i32 to vector<2x1xi32>
    %138 = arith.cmpi sgt, %8, %137 : vector<2x1xi32>
    %139 = vector.shape_cast %138 : vector<2x1xi1> to vector<2x1xi1>
    %140 = vector.broadcast %139 : vector<2x1xi1> to vector<2x32xi1>
    %141 = arith.select %140, %136, %107 : vector<2x32xi1>, vector<2x32xf32>
    %142 = vector.shape_cast %138 : vector<2x1xi1> to vector<2x1xi1>
    %143 = vector.broadcast %142 : vector<2x1xi1> to vector<2x32xi1>
    %144 = arith.select %143, %134, %110 : vector<2x32xi1>, vector<2x32xf32>
    %cst_32 = arith.constant 0.000000e+00 : f32
    %145 = vector.shape_cast %138 : vector<2x1xi1> to vector<2x1xi1>
    %146 = vector.broadcast %145 : vector<2x1xi1> to vector<2x32xi1>
    %147 = vector.broadcast %cst_32 : f32 to vector<2x32xf32>
    %148 = arith.select %146, %136, %147 : vector<2x32xi1>, vector<2x32xf32>
    %c0_33 = arith.constant 0 : index
    %c3 = arith.constant 3 : index
    %c0_34 = arith.constant 0 : index
    %149 = vector.load %arg10[%c0_33, %c3, %c0_34] : memref<2x8x32xf32, #tpu.memory_space<vmem>>, vector<2x1x32xf32>
    %150 = vector.shape_cast %149 : vector<2x1x32xf32> to vector<2x32xf32>
    %151 = vector.shape_cast %148 : vector<2x32xf32> to vector<2x1x32xf32>
    tpu.vector_store %arg10[%c0_33, %c3, %c0_34], %151 {strides = array<i32>} : memref<2x8x32xf32, #tpu.memory_space<vmem>>, vector<2x1x32xf32>,
    %152 = vector.extract_strided_slice %7 {offsets = [0, 4, 0], sizes = [2, 1, 128], strides = [1, 1, 1]} : vector<2x8x128xf32> to vector<2x1x128xf32>
    %153 = vector.shape_cast %152 : vector<2x1x128xf32> to vector<2x128xf32>
    %cst_35 = arith.constant dense<0.000000e+00> : vector<2x128xf32>
    %154 = tpu.matmul %141, %9, %cst_35 {dimension_numbers = #tpu.dot_dimension_numbers<[1], [0], [0], [1], [0, 0, 1, 1], [], []>} : vector<2x32xf32>, vector<32x128xf32>, vector<2x128xf32> -> vector<2x128xf32>
    %155 = arith.addf %153, %154 : vector<2x128xf32>
    %156 = arith.negf %155 : vector<2x128xf32>
    %157 = math.exp %156 : vector<2x128xf32>
    %cst_36 = arith.constant 1.000000e+00 : f32
    %158 = vector.broadcast %cst_36 : f32 to vector<2x128xf32>
    %159 = arith.addf %158, %157 : vector<2x128xf32>
    %160 = arith.divf %158, %159 : vector<2x128xf32>
    %161 = math.tanh %155 : vector<2x128xf32>
    %162 = vector.extract_strided_slice %160 {offsets = [0, 0], sizes = [2, 32], strides = [1, 1]} : vector<2x128xf32> to vector<2x32xf32>
    %163 = vector.extract_strided_slice %160 {offsets = [0, 32], sizes = [2, 32], strides = [1, 1]} : vector<2x128xf32> to vector<2x32xf32>
    %164 = vector.extract_strided_slice %161 {offsets = [0, 64], sizes = [2, 32], strides = [1, 1]} : vector<2x128xf32> to vector<2x32xf32>
    %165 = vector.extract_strided_slice %160 {offsets = [0, 96], sizes = [2, 32], strides = [1, 1]} : vector<2x128xf32> to vector<2x32xf32>
    %166 = arith.mulf %163, %144 : vector<2x32xf32>
    %167 = arith.mulf %162, %164 : vector<2x32xf32>
    %168 = arith.addf %166, %167 : vector<2x32xf32>
    %169 = math.tanh %168 : vector<2x32xf32>
    %170 = arith.mulf %165, %169 : vector<2x32xf32>
    %c4_i32 = arith.constant 4 : i32
    %171 = vector.broadcast %c4_i32 : i32 to vector<2x1xi32>
    %172 = arith.cmpi sgt, %8, %171 : vector<2x1xi32>
    %173 = vector.shape_cast %172 : vector<2x1xi1> to vector<2x1xi1>
    %174 = vector.broadcast %173 : vector<2x1xi1> to vector<2x32xi1>
    %175 = arith.select %174, %170, %141 : vector<2x32xi1>, vector<2x32xf32>
    %176 = vector.shape_cast %172 : vector<2x1xi1> to vector<2x1xi1>
    %177 = vector.broadcast %176 : vector<2x1xi1> to vector<2x32xi1>
    %178 = arith.select %177, %168, %144 : vector<2x32xi1>, vector<2x32xf32>
    %cst_37 = arith.constant 0.000000e+00 : f32
    %179 = vector.shape_cast %172 : vector<2x1xi1> to vector<2x1xi1>
    %180 = vector.broadcast %179 : vector<2x1xi1> to vector<2x32xi1>
    %181 = vector.broadcast %cst_37 : f32 to vector<2x32xf32>
    %182 = arith.select %180, %170, %181 : vector<2x32xi1>, vector<2x32xf32>
    %c0_38 = arith.constant 0 : index
    %c4 = arith.constant 4 : index
    %c0_39 = arith.constant 0 : index
    %183 = vector.load %arg10[%c0_38, %c4, %c0_39] : memref<2x8x32xf32, #tpu.memory_space<vmem>>, vector<2x1x32xf32>
    %184 = vector.shape_cast %183 : vector<2x1x32xf32> to vector<2x32xf32>
    %185 = vector.shape_cast %182 : vector<2x32xf32> to vector<2x1x32xf32>
    tpu.vector_store %arg10[%c0_38, %c4, %c0_39], %185 {strides = array<i32>} : memref<2x8x32xf32, #tpu.memory_space<vmem>>, vector<2x1x32xf32>,
    %186 = vector.extract_strided_slice %7 {offsets = [0, 5, 0], sizes = [2, 1, 128], strides = [1, 1, 1]} : vector<2x8x128xf32> to vector<2x1x128xf32>
    %187 = vector.shape_cast %186 : vector<2x1x128xf32> to vector<2x128xf32>
    %cst_40 = arith.constant dense<0.000000e+00> : vector<2x128xf32>
    %188 = tpu.matmul %175, %9, %cst_40 {dimension_numbers = #tpu.dot_dimension_numbers<[1], [0], [0], [1], [0, 0, 1, 1], [], []>} : vector<2x32xf32>, vector<32x128xf32>, vector<2x128xf32> -> vector<2x128xf32>
    %189 = arith.addf %187, %188 : vector<2x128xf32>
    %190 = arith.negf %189 : vector<2x128xf32>
    %191 = math.exp %190 : vector<2x128xf32>
    %cst_41 = arith.constant 1.000000e+00 : f32
    %192 = vector.broadcast %cst_41 : f32 to vector<2x128xf32>
    %193 = arith.addf %192, %191 : vector<2x128xf32>
    %194 = arith.divf %192, %193 : vector<2x128xf32>
    %195 = math.tanh %189 : vector<2x128xf32>
    %196 = vector.extract_strided_slice %194 {offsets = [0, 0], sizes = [2, 32], strides = [1, 1]} : vector<2x128xf32> to vector<2x32xf32>
    %197 = vector.extract_strided_slice %194 {offsets = [0, 32], sizes = [2, 32], strides = [1, 1]} : vector<2x128xf32> to vector<2x32xf32>
    %198 = vector.extract_strided_slice %195 {offsets = [0, 64], sizes = [2, 32], strides = [1, 1]} : vector<2x128xf32> to vector<2x32xf32>
    %199 = vector.extract_strided_slice %194 {offsets = [0, 96], sizes = [2, 32], strides = [1, 1]} : vector<2x128xf32> to vector<2x32xf32>
    %200 = arith.mulf %197, %178 : vector<2x32xf32>
    %201 = arith.mulf %196, %198 : vector<2x32xf32>
    %202 = arith.addf %200, %201 : vector<2x32xf32>
    %203 = math.tanh %202 : vector<2x32xf32>
    %204 = arith.mulf %199, %203 : vector<2x32xf32>
    %c5_i32 = arith.constant 5 : i32
    %205 = vector.broadcast %c5_i32 : i32 to vector<2x1xi32>
    %206 = arith.cmpi sgt, %8, %205 : vector<2x1xi32>
    %207 = vector.shape_cast %206 : vector<2x1xi1> to vector<2x1xi1>
    %208 = vector.broadcast %207 : vector<2x1xi1> to vector<2x32xi1>
    %209 = arith.select %208, %204, %175 : vector<2x32xi1>, vector<2x32xf32>
    %210 = vector.shape_cast %206 : vector<2x1xi1> to vector<2x1xi1>
    %211 = vector.broadcast %210 : vector<2x1xi1> to vector<2x32xi1>
    %212 = arith.select %211, %202, %178 : vector<2x32xi1>, vector<2x32xf32>
    %cst_42 = arith.constant 0.000000e+00 : f32
    %213 = vector.shape_cast %206 : vector<2x1xi1> to vector<2x1xi1>
    %214 = vector.broadcast %213 : vector<2x1xi1> to vector<2x32xi1>
    %215 = vector.broadcast %cst_42 : f32 to vector<2x32xf32>
    %216 = arith.select %214, %204, %215 : vector<2x32xi1>, vector<2x32xf32>
    %c0_43 = arith.constant 0 : index
    %c5 = arith.constant 5 : index
    %c0_44 = arith.constant 0 : index
    %217 = vector.load %arg10[%c0_43, %c5, %c0_44] : memref<2x8x32xf32, #tpu.memory_space<vmem>>, vector<2x1x32xf32>
    %218 = vector.shape_cast %217 : vector<2x1x32xf32> to vector<2x32xf32>
    %219 = vector.shape_cast %216 : vector<2x32xf32> to vector<2x1x32xf32>
    tpu.vector_store %arg10[%c0_43, %c5, %c0_44], %219 {strides = array<i32>} : memref<2x8x32xf32, #tpu.memory_space<vmem>>, vector<2x1x32xf32>,
    %220 = vector.extract_strided_slice %7 {offsets = [0, 6, 0], sizes = [2, 1, 128], strides = [1, 1, 1]} : vector<2x8x128xf32> to vector<2x1x128xf32>
    %221 = vector.shape_cast %220 : vector<2x1x128xf32> to vector<2x128xf32>
    %cst_45 = arith.constant dense<0.000000e+00> : vector<2x128xf32>
    %222 = tpu.matmul %209, %9, %cst_45 {dimension_numbers = #tpu.dot_dimension_numbers<[1], [0], [0], [1], [0, 0, 1, 1], [], []>} : vector<2x32xf32>, vector<32x128xf32>, vector<2x128xf32> -> vector<2x128xf32>
    %223 = arith.addf %221, %222 : vector<2x128xf32>
    %224 = arith.negf %223 : vector<2x128xf32>
    %225 = math.exp %224 : vector<2x128xf32>
    %cst_46 = arith.constant 1.000000e+00 : f32
    %226 = vector.broadcast %cst_46 : f32 to vector<2x128xf32>
    %227 = arith.addf %226, %225 : vector<2x128xf32>
    %228 = arith.divf %226, %227 : vector<2x128xf32>
    %229 = math.tanh %223 : vector<2x128xf32>
    %230 = vector.extract_strided_slice %228 {offsets = [0, 0], sizes = [2, 32], strides = [1, 1]} : vector<2x128xf32> to vector<2x32xf32>
    %231 = vector.extract_strided_slice %228 {offsets = [0, 32], sizes = [2, 32], strides = [1, 1]} : vector<2x128xf32> to vector<2x32xf32>
    %232 = vector.extract_strided_slice %229 {offsets = [0, 64], sizes = [2, 32], strides = [1, 1]} : vector<2x128xf32> to vector<2x32xf32>
    %233 = vector.extract_strided_slice %228 {offsets = [0, 96], sizes = [2, 32], strides = [1, 1]} : vector<2x128xf32> to vector<2x32xf32>
    %234 = arith.mulf %231, %212 : vector<2x32xf32>
    %235 = arith.mulf %230, %232 : vector<2x32xf32>
    %236 = arith.addf %234, %235 : vector<2x32xf32>
    %237 = math.tanh %236 : vector<2x32xf32>
    %238 = arith.mulf %233, %237 : vector<2x32xf32>
    %c6_i32 = arith.constant 6 : i32
    %239 = vector.broadcast %c6_i32 : i32 to vector<2x1xi32>
    %240 = arith.cmpi sgt, %8, %239 : vector<2x1xi32>
    %241 = vector.shape_cast %240 : vector<2x1xi1> to vector<2x1xi1>
    %242 = vector.broadcast %241 : vector<2x1xi1> to vector<2x32xi1>
    %243 = arith.select %242, %238, %209 : vector<2x32xi1>, vector<2x32xf32>
    %244 = vector.shape_cast %240 : vector<2x1xi1> to vector<2x1xi1>
    %245 = vector.broadcast %244 : vector<2x1xi1> to vector<2x32xi1>
    %246 = arith.select %245, %236, %212 : vector<2x32xi1>, vector<2x32xf32>
    %cst_47 = arith.constant 0.000000e+00 : f32
    %247 = vector.shape_cast %240 : vector<2x1xi1> to vector<2x1xi1>
    %248 = vector.broadcast %247 : vector<2x1xi1> to vector<2x32xi1>
    %249 = vector.broadcast %cst_47 : f32 to vector<2x32xf32>
    %250 = arith.select %248, %238, %249 : vector<2x32xi1>, vector<2x32xf32>
    %c0_48 = arith.constant 0 : index
    %c6 = arith.constant 6 : index
    %c0_49 = arith.constant 0 : index
    %251 = vector.load %arg10[%c0_48, %c6, %c0_49] : memref<2x8x32xf32, #tpu.memory_space<vmem>>, vector<2x1x32xf32>
    %252 = vector.shape_cast %251 : vector<2x1x32xf32> to vector<2x32xf32>
    %253 = vector.shape_cast %250 : vector<2x32xf32> to vector<2x1x32xf32>
    tpu.vector_store %arg10[%c0_48, %c6, %c0_49], %253 {strides = array<i32>} : memref<2x8x32xf32, #tpu.memory_space<vmem>>, vector<2x1x32xf32>,
    %254 = vector.extract_strided_slice %7 {offsets = [0, 7, 0], sizes = [2, 1, 128], strides = [1, 1, 1]} : vector<2x8x128xf32> to vector<2x1x128xf32>
    %255 = vector.shape_cast %254 : vector<2x1x128xf32> to vector<2x128xf32>
    %cst_50 = arith.constant dense<0.000000e+00> : vector<2x128xf32>
    %256 = tpu.matmul %243, %9, %cst_50 {dimension_numbers = #tpu.dot_dimension_numbers<[1], [0], [0], [1], [0, 0, 1, 1], [], []>} : vector<2x32xf32>, vector<32x128xf32>, vector<2x128xf32> -> vector<2x128xf32>
    %257 = arith.addf %255, %256 : vector<2x128xf32>
    %258 = arith.negf %257 : vector<2x128xf32>
    %259 = math.exp %258 : vector<2x128xf32>
    %cst_51 = arith.constant 1.000000e+00 : f32
    %260 = vector.broadcast %cst_51 : f32 to vector<2x128xf32>
    %261 = arith.addf %260, %259 : vector<2x128xf32>
    %262 = arith.divf %260, %261 : vector<2x128xf32>
    %263 = math.tanh %257 : vector<2x128xf32>
    %264 = vector.extract_strided_slice %262 {offsets = [0, 0], sizes = [2, 32], strides = [1, 1]} : vector<2x128xf32> to vector<2x32xf32>
    %265 = vector.extract_strided_slice %262 {offsets = [0, 32], sizes = [2, 32], strides = [1, 1]} : vector<2x128xf32> to vector<2x32xf32>
    %266 = vector.extract_strided_slice %263 {offsets = [0, 64], sizes = [2, 32], strides = [1, 1]} : vector<2x128xf32> to vector<2x32xf32>
    %267 = vector.extract_strided_slice %262 {offsets = [0, 96], sizes = [2, 32], strides = [1, 1]} : vector<2x128xf32> to vector<2x32xf32>
    %268 = arith.mulf %265, %246 : vector<2x32xf32>
    %269 = arith.mulf %264, %266 : vector<2x32xf32>
    %270 = arith.addf %268, %269 : vector<2x32xf32>
    %271 = math.tanh %270 : vector<2x32xf32>
    %272 = arith.mulf %267, %271 : vector<2x32xf32>
    %c7_i32 = arith.constant 7 : i32
    %273 = vector.broadcast %c7_i32 : i32 to vector<2x1xi32>
    %274 = arith.cmpi sgt, %8, %273 : vector<2x1xi32>
    %cst_52 = arith.constant 0.000000e+00 : f32
    %275 = vector.shape_cast %274 : vector<2x1xi1> to vector<2x1xi1>
    %276 = vector.broadcast %275 : vector<2x1xi1> to vector<2x32xi1>
    %277 = vector.broadcast %cst_52 : f32 to vector<2x32xf32>
    %278 = arith.select %276, %272, %277 : vector<2x32xi1>, vector<2x32xf32>
    %c0_53 = arith.constant 0 : index
    %c7 = arith.constant 7 : index
    %c0_54 = arith.constant 0 : index
    %279 = vector.load %arg10[%c0_53, %c7, %c0_54] : memref<2x8x32xf32, #tpu.memory_space<vmem>>, vector<2x1x32xf32>
    %280 = vector.shape_cast %279 : vector<2x1x32xf32> to vector<2x32xf32>
    %281 = vector.shape_cast %278 : vector<2x32xf32> to vector<2x1x32xf32>
    tpu.vector_store %arg10[%c0_53, %c7, %c0_54], %281 {strides = array<i32>} : memref<2x8x32xf32, #tpu.memory_space<vmem>>, vector<2x1x32xf32>,
    %c0_55 = arith.constant 0 : index
    %c0_56 = arith.constant 0 : index
    %c0_57 = arith.constant 0 : index
    %282 = vector.load %arg10[%c0_55, %c0_56, %c0_57] : memref<2x8x32xf32, #tpu.memory_space<vmem>>, vector<2x8x32xf32>
    %283 = vector.shape_cast %282 : vector<2x8x32xf32> to vector<16x32xf32>
    %c0_58 = arith.constant 0 : index
    %c0_59 = arith.constant 0 : index
    %284 = vector.load %arg5[%c0_58, %c0_59] : memref<32x8xf32, #tpu.memory_space<vmem>>, vector<32x8xf32>
    %cst_60 = arith.constant dense<0.000000e+00> : vector<16x8xf32>
    %285 = tpu.matmul %283, %284, %cst_60 {dimension_numbers = #tpu.dot_dimension_numbers<[1], [0], [0], [1], [0, 0, 1, 1], [], []>} : vector<16x32xf32>, vector<32x8xf32>, vector<16x8xf32> -> vector<16x8xf32>
    %c0_61 = arith.constant 0 : index
    %c0_62 = arith.constant 0 : index
    %286 = vector.load %arg6[%c0_61, %c0_62] : memref<1x8xf32, #tpu.memory_space<vmem>>, vector<1x8xf32>
    %287 = vector.broadcast %286 : vector<1x8xf32> to vector<16x8xf32>
    %288 = arith.addf %285, %287 : vector<16x8xf32>
    %289 = vector.shape_cast %288 : vector<16x8xf32> to vector<2x8x8xf32>
    %c0_63 = arith.constant 0 : index
    %c0_64 = arith.constant 0 : index
    %c0_65 = arith.constant 0 : index
    %290 = vector.load %arg9[%c0_63, %c0_64, %c0_65] : memref<2x8x8xf32, #tpu.memory_space<vmem>>, vector<2x8x8xf32>
    tpu.vector_store %arg9[%c0_63, %c0_64, %c0_65], %289 {strides = array<i32>} : memref<2x8x8xf32, #tpu.memory_space<vmem>>, vector<2x8x8xf32>,
    return
  }
}

</mosaic_0001>

<bundles_post_ra>
// kernel: tpu_custom_call.1
= control target key start
LH: loop header
LB: loop body
LE: loop exit
PB: predicated region body
PF: predicated region fallthrough
CT: control target
= control target key end

     0   :  { %14 = vsyncpa [#allocation4], 0  ;;  %s1937_s0 = inlined_call_operand.hbm [shape: f32[2,8,16], index: 0, kind: input, shape index: {}]   ;;  %s1938_s1 = inlined_call_operand.vmem [shape: s32[2,1], index: 1, kind: input, shape index: {}]   ;;  %s1939_s2 = inlined_call_operand.hbm [shape: f32[16,128], index: 2, kind: input, shape index: {}]   ;;  %s1940_s3 = inlined_call_operand.vmem [shape: f32[32,128], index: 3, kind: input, shape index: {}]   ;;  %s1941_s4 = inlined_call_operand.vmem [shape: f32[1,128], index: 4, kind: input, shape index: {}]   ;;  %s1942_s5 = inlined_call_operand.vmem [shape: f32[32,8], index: 5, kind: input, shape index: {}]   ;;  %s1943_s6 = inlined_call_operand.vmem [shape: f32[1,8], index: 6, kind: input, shape index: {}]   ;;  %s1944_s7 = inlined_call_operand.vmem [shape: f32[1,32], index: 7, kind: input, shape index: {}]   ;;  %s1945_s8 = inlined_call_operand.vmem [shape: f32[1,32], index: 8, kind: input, shape index: {}]   ;;  %s1946_s9 = inlined_call_operand.hbm [shape: f32[2,8,8], index: 9, kind: output, shape index: {}]  }
   0x1   :  { %15 = vsyncpa [#allocation7], 0 }
   0x2   :  { %16 = vsyncpa [#allocation5], 0  ;;  %s21_s11 = sshll.u32 %s1937_s0, 4  ;;  %s1552_s12 = smov [#allocation3]   ;;  %s22_s11 = int_to_ptr.hbm [resolvable:$true] %s21_s11 }
   0x3   :  { %s23_s13 = sshll.u32 %s1552_s12, 4  ;;  %s36_s16 = sshll.u32 %s1939_s2, 4  ;;  %s24_s13 = int_to_ptr.vmem [resolvable:$true] %s23_s13  ;;  %s37_s16 = int_to_ptr.hbm [resolvable:$true] %s36_s16 }
   0x4   :  { %s1553_s17 = smov 128   ;;  %s1554_s18 = smov 8  }
   0x5   :  { %29 = dma.hbm_to_vmem [thread:$0]  %s22_s11, 256, %s24_s13, [#allocation4], %s1553_s17, %s1553_s17, %s1554_s18  }
   0x6   :  { %s1555_s19 = smov [#allocation6]  }
   0x7   :  { %s38_s20 = sshll.u32 %s1555_s19, 4  ;;  %s39_s20 = int_to_ptr.vmem [resolvable:$true] %s38_s20 }
   0x8   :  { %44 = dma.hbm_to_vmem [thread:$0]  %s37_s16, 256, %s39_s20, [#allocation7], %s1553_s17, %s1553_s17, %s1554_s18  }
   0x9   :  { %1546 = dma.done.wait [#allocation4], 256  }
   0xa   :  { %1547 = vsyncadd [#allocation4], 4294967040 }
   0xb   :  { %1548 = dma.done.wait [#allocation7], 256  }
   0xc   :  { %1549 = vsyncadd [#allocation7], 4294967040  ;;  %v68_v0 = vld [vmem:[#allocation6 + $0x8] sm:$0xff]  ;;  %v1626_v1 = vld [vmem:[%s1940_s3 + $0x18] sm:$0xff]  ;;  %vm73_vm0 = vcmask 130048   ;;  %vm116_vm1 = vcmask 261120  }
   0xd   :  { %v67_v2 = vld [vmem:[#allocation6] sm:$0xff]  ;;  %94 = vmatpush.msra.mxu0 %v68_v0  ;;  %131 = vmatpush.msra.mxu1 %v1626_v1  ;;  %v1632_v3 = vld [vmem:[%s1940_s3 + $0x10] sm:$0xff]  ;;  %v1637_v5 = vld [vmem:[%s1940_s3 + $0x8] sm:$0xff]  ;;  %s1556_s10 = smov 32   ;;  %v1558_v52 = vmov 0   ;;  %vm231_vm11 = vcmask 1041409  }
   0xe   :  { %v65_v4 = vld [vmem:[#allocation3] sm:$0xff]  ;;  %267 = vmatpush.msra.mxu3 %v1626_v1  ;;  %692 = vmatpush.msra.mxu2 %v1626_v1  ;;  %v1645_v6 = vld [vmem:[%s1940_s3] sm:$0xff]  ;;  %v66_v9 = vld [vmem:[#allocation3 + $0x8] sm:$0xff]  ;;  %s1559_s12 = smov 96   ;;  %vm249_vm13 = vcmask 253952   ;;  %s1287_s27 = sshll.u32 %s1946_s9, 4  ;;  %s1288_s27 = int_to_ptr.hbm [resolvable:$true] %s1287_s27 }
   0xf   :  { %95 = vmatpush.msra.mxu0 %v67_v2  ;;  %132 = vmatpush.msra.mxu1 %v1632_v3  ;;  %v1650_v7 = vld [vmem:[%s1945_s8] ss:$0 sm:$0xff]  ;;  %s1557_s8 = smov 64  }
  0x10   :  { %1301 = vmatmul.msk.f32.vlgmr.msra.gmra.mxu0 %vm73_vm0, %v65_v4  ;;  %v1656_v8 = vld [vmem:[%s1944_s7] ss:$0 sm:$0xff]  ;;  %268 = vmatpush.msra.mxu3 %v1632_v3 }
  0x11   :  { %133 = vmatpush.msra.mxu1 %v1637_v5  ;;  %185 = vrot.lane.b32.xlu1 %v1650_v7, %s1556_s10  ;;  %v1343_v12 = vld [vmem:[%s1941_s4] ss:$0 sm:$0xff] }
  0x12   :  { %269 = vmatpush.msra.mxu3 %v1637_v5  ;;  %693 = vmatpush.msra.mxu2 %v1632_v3  ;;  %v1703_v51 = vld [vmem:[%s1938_s1] sm:$0x3] }
  0x13   :  { %134 = vmatpush.msra.mxu1 %v1645_v6  ;;  %978 = vmatpush.msrb.mxu0 %v1626_v1  ;;  %vm222_vm10 = vcmp.gt.s32.totalorder %v1703_v51, 0 }
  0x14   :  { %1303 = vmatmul.msk.f32.vlgmr.msra.gmra.mxu1 %vm116_vm1, %v1656_v8  ;;  %270 = vmatpush.msra.mxu3 %v1645_v6  ;;  %v223_v53 = vsel %vm222_vm10, 1, %v1558_v52 }
  0x15   :  { %549 = vmatpush.msrb.mxu1 %v1626_v1  ;;  %694 = vmatpush.msra.mxu2 %v1637_v5 }
  0x16   :  { %406 = vmatpush.msrb.mxu3 %v1626_v1  ;;  %979 = vmatpush.msrb.mxu0 %v1632_v3 }
  0x17   :  { %550 = vmatpush.msrb.mxu1 %v1632_v3  ;;  %695 = vmatpush.msra.mxu2 %v1645_v6 }
  0x18   :  { %407 = vmatpush.msrb.mxu3 %v1632_v3  ;;  %1302 = vmatmul.msk.f32.gmra.mxu0 %vm73_vm0, %v66_v9 }
  0x19   :  { %551 = vmatpush.msrb.mxu1 %v1637_v5  ;;  %980 = vmatpush.msrb.mxu0 %v1637_v5 }
  0x1a   :  { %408 = vmatpush.msrb.mxu3 %v1637_v5  ;;  %1338 = vset.pattern.permute.xlu1 %v1558_v52 }
  0x1b   :  { %552 = vmatpush.msrb.mxu1 %v1645_v6  ;;  %981 = vmatpush.msrb.mxu0 %v1645_v6 }
  0x1c   :  { %409 = vmatpush.msrb.mxu3 %v1645_v6  ;;  %1339 = vset.pattern.permute.xlu0 %v1558_v52 }
  0x1d   :  { %1121 = vmatpush.msra.mxu1 %v1626_v1  ;;  %1340 = vset.pattern.permute.xlu2 %v1558_v52 }
  0x1f   :  { %1122 = vmatpush.msra.mxu1 %v1632_v3 }
  0x21   :  { %1123 = vmatpush.msra.mxu1 %v1637_v5 }
  0x23   :  { %1124 = vmatpush.msra.mxu1 %v1645_v6 }
  0x83   :  { %v186_v54 = vpop.permute.xlu1 %185 }
  0x8d   :  { %v97_v10 = vpop.f32.mrf.mxu0 }
  0x8e   :  { %v1693_v17 = vadd.f32 %v1343_v12, %v97_v10 }
  0x91   :  { %v136_v11 = vpop.f32.mrf.mxu1 }
  0x92   :  { %v140_v13 = vrot.slane %v136_v11, 1  ;;  %v143_v18 = vadd.f32 %v136_v11, %v1693_v17 }
  0x94   :  { %v1304_v22 = vmul.f32 -1.442695, %v143_v18 }
  0x95   :  { %v100_v14 = vpop.f32.mrf.mxu0 }
  0x96   :  { %v1690_v15 = vadd.f32 %v1343_v12, %v100_v14 }
  0x98   :  { %v144_v16 = vadd.f32 %v140_v13, %v1690_v15 }
  0x9a   :  { %1345 = vtanh.f32 %v144_v16  ;;  %v1305_v21 = vmul.f32 -1.442695, %v144_v16 }
  0x9b   :  { %1347 = vtanh.f32 %v143_v18 }
  0x9c   :  { %1349 = vpow2.f32 %v1305_v21 }
  0x9d   :  { %1351 = vpow2.f32 %v1304_v22 }
  0xa0   :  { %v1346_v19 = vpop.eup %1345 }
  0xa1   :  { %194 = vrot.lane.b32.xlu0 %v1346_v19, %s1557_s8  ;;  %v1348_v20 = vpop.eup %1347 }
  0xa2   :  { %v1350_v23 = vpop.eup %1349 }
  0xa3   :  { %v152_v24 = vadd.f32 1.0, %v1350_v23  ;;  %v1352_v25 = vpop.eup %1351 }
  0xa4   :  { %v151_v26 = vadd.f32 1.0, %v1352_v25 }
  0xa5   :  { %1353 = vrcp.f32 %v152_v24  ;;  %v179_v35 = vand.u32 2147483648, %v152_v24  ;;  %vm173_vm3 = vweird.f32 %v152_v24  ;;  %v177_v36 = vand.u32 2147483647, %v152_v24 }
  0xa6   :  { %1355 = vrcp.f32 %v151_v26  ;;  %v164_v44 = vand.u32 2147483648, %v151_v26  ;;  %vm158_vm7 = vweird.f32 %v151_v26  ;;  %v162_v45 = vand.u32 2147483647, %v151_v26 }
  0xa7   :  { %v180_v39 = vor.u32 1.1754944e-38, %v179_v35  ;;  %vm178_vm5 = vcmp.eq.f32.partialorder %v177_v36, 8.507059e+37 }
  0xa8   :  { %v165_v47 = vor.u32 1.1754944e-38, %v164_v44  ;;  %vm163_vm9 = vcmp.eq.f32.partialorder %v162_v45, 8.507059e+37 }
  0xa9   :  { %192 = vrot.lane.b32.xlu0 %v1348_v20, %s1557_s8 }
  0xab   :  { %v1354_v27 = vpop.eup %1353 }
  0xac   :  { %v169_v28 = vmul.f32 %v1354_v27, %v152_v24  ;;  %v1356_v30 = vpop.eup %1355  ;;  %vm174_vm2 = vweird.f32 %v1354_v27 }
  0xad   :  { %v154_v31 = vmul.f32 %v1356_v30, %v151_v26  ;;  %vm175_vm4 = vmor %vm173_vm3, %vm174_vm2  ;;  %vm159_vm6 = vweird.f32 %v1356_v30  ;;  %vm363_vm3 = vcmp.gt.s32.totalorder %v1703_v51, 1 }
  0xae   :  { %v170_v29 = vsub.f32 1.0, %v169_v28  ;;  %vm160_vm8 = vmor %vm158_vm7, %vm159_vm6 }
  0xaf   :  { %v155_v33 = vsub.f32 1.0, %v154_v31 }
  0xb0   :  { %v171_v32 = vmul.f32 %v1354_v27, %v170_v29 }
  0xb1   :  { %v156_v37 = vmul.f32 %v1356_v30, %v155_v33 }
  0xb2   :  { %v172_v34 = vadd.f32 %v1354_v27, %v171_v32 }
  0xb3   :  { %v157_v42 = vadd.f32 %v1356_v30, %v156_v37 }
  0xb4   :  { %v176_v38 = vsel %vm175_vm4, %v1354_v27, %v172_v34 }
  0xb5   :  { %v181_v40 = vsel %vm178_vm5, %v180_v39, %v176_v38  ;;  %v161_v46 = vsel %vm160_vm8, %v1356_v30, %v157_v42 }
  0xb6   :  { %v166_v48 = vsel %vm163_vm9, %v165_v47, %v161_v46  ;;  %v189_v59 = vmul.f32 %v186_v54, %v181_v40 }
  0xb7   :  { %v188_v55 = vmul.f32 %v186_v54, %v166_v48 }
 0x113   :  { %v195_v41 = vpop.permute.xlu0 %194 }
 0x114   :  { %v199_v43 = vmul.f32 %v195_v41, %v181_v40 }
 0x116   :  { %204 = vrot.lane.b32.xlu1 %v199_v43, %s1556_s10  ;;  %v364_v43 = vsel %vm363_vm3, 1, %v1558_v52 }
 0x11b   :  { %v193_v49 = vpop.permute.xlu0 %192 }
 0x11c   :  { %v198_v50 = vmul.f32 %v193_v49, %v166_v48 }
 0x11e   :  { %202 = vrot.lane.b32.xlu2 %v198_v50, %s1556_s10  ;;  %225 = vperm.xlu1 %1338, %v223_v53  }
 0x178   :  { %v203_v56 = vpop.permute.xlu2 %202 }
 0x179   :  { %v208_v57 = vadd.f32 %v203_v56, %v188_v55 }
 0x17b   :  { %1357 = vtanh.f32 %v208_v57 }
 0x181   :  { %v1358_v58 = vpop.eup %1357 }
 0x182   :  { %214 = vrot.lane.b32.xlu0 %v1358_v58, %s1557_s8 }
 0x188   :  { %v205_v60 = vpop.permute.xlu1 %204 }
 0x189   :  { %v209_v61 = vadd.f32 %v205_v60, %v189_v59 }
 0x18b   :  { %1359 = vtanh.f32 %v209_v61  ;;  %v239_v62 = vrot.slane %v209_v61, 7 }
 0x18d   :  { %v240_v63 = vsel %vm231_vm11, %v239_v62, %v208_v57 }
 0x18e   :  { %241 = vrot.lane.b32.xlu0 %v240_v63, %s1559_s12 }
 0x190   :  { %v226_v13 = vpop.permute.xlu1 %225 }
 0x191   :  { %v1360_v0 = vpop.eup %1359  ;;  %vm227_vm12 = vcmp.eq.s32.totalorder %v226_v13, 1 }
 0x192   :  { %216 = vrot.lane.b32.xlu2 %v1360_v0, %s1557_s8 }
 0x1ec   :  { %v217_v2 = vpop.permute.xlu2 %216 }
 0x1ed   :  { %v221_v4 = vmul.f32 %v217_v2, %v181_v40 }
 0x1ef   :  { %v230_v10 = vrot.slane %v221_v4, 7 }
 0x1f4   :  { %v215_v9 = vpop.permute.xlu0 %214 }
 0x1f5   :  { %v220_v11 = vmul.f32 %v215_v9, %v166_v48 }
 0x1f7   :  { %v232_v12 = vsel %vm231_vm11, %v230_v10, %v220_v11 }
 0x1f8   :  { %233 = vrot.lane.b32.xlu2 %v232_v12, %s1556_s10 }
 0x200   :  { %v242_v14 = vpop.permute.xlu0 %241 }
 0x201   :  { %v1717_v16 = vsel %vm227_vm12, %v242_v14, %v1650_v7 }
 0x202   :  { %v322_v18 = vrot.slane %v1717_v16, 7 }
 0x204   :  { %323 = vrot.lane.b32.xlu0 %v322_v18, %s1556_s10 }
 0x252   :  { %v234_v19 = vpop.permute.xlu2 %233 }
 0x253   :  { %v245_v20 = vsel %vm227_vm12, %v234_v19, 0.0  ;;  %v1722_v21 = vsel %vm227_vm12, %v234_v19, %v1656_v8 }
 0x254   :  { %v247_v22 = vrot.slane %v245_v20, 1  ;;  %250 = vst.msk [vmem:[#allocation2] sm:$0x1] %vm249_vm13, %v245_v20  ;;  %1306 = vmatmul.msk.f32.vlgmr.msra.gmra.mxu3 %vm116_vm1, %v1722_v21 }
 0x255   :  { %835 = vmatpush.msra.mxu3 %v1626_v1 }
 0x256   :  { %251 = vst.msk [vmem:[#allocation2 + $0x8] sm:$0x1] %vm249_vm13, %v247_v22 }
 0x257   :  { %836 = vmatpush.msra.mxu3 %v1632_v3 }
 0x259   :  { %837 = vmatpush.msra.mxu3 %v1637_v5 }
 0x25b   :  { %838 = vmatpush.msra.mxu3 %v1645_v6 }
 0x276   :  { %v324_v56 = vpop.permute.xlu0 %323 }
 0x2d7   :  { %v272_v7 = vpop.f32.mrf.mxu3 }
 0x2d8   :  { %v276_v23 = vrot.slane %v272_v7, 7  ;;  %v280_v8 = vadd.f32 %v272_v7, %v1690_v15 }
 0x2da   :  { %v279_v24 = vadd.f32 %v276_v23, %v1693_v17  ;;  %1361 = vtanh.f32 %v280_v8  ;;  %v1308_v3 = vmul.f32 -1.442695, %v280_v8 }
 0x2dc   :  { %1363 = vtanh.f32 %v279_v24  ;;  %v1307_v28 = vmul.f32 -1.442695, %v279_v24 }
 0x2dd   :  { %1365 = vpow2.f32 %v1308_v3 }
 0x2e0   :  { %v1362_v25 = vpop.eup %1361 }
 0x2e1   :  { %335 = vrot.lane.b32.xlu2 %v1362_v25, %s1557_s8 }
 0x2e2   :  { %v1364_v1 = vpop.eup %1363 }
 0x2e3   :  { %333 = vrot.lane.b32.xlu1 %v1364_v1, %s1557_s8  ;;  %v1366_v5 = vpop.eup %1365 }
 0x2e4   :  { %v288_v6 = vadd.f32 1.0, %v1366_v5 }
 0x2e6   :  { %1367 = vrcp.f32 %v288_v6  ;;  %v315_v33 = vand.u32 2147483648, %v288_v6  ;;  %vm309_vm15 = vweird.f32 %v288_v6  ;;  %v313_v35 = vand.u32 2147483647, %v288_v6 }
 0x2e7   :  { %1369 = vpow2.f32 %v1307_v28 }
 0x2e8   :  { %v316_v37 = vor.u32 1.1754944e-38, %v315_v33  ;;  %vm314_vm2 = vcmp.eq.f32.partialorder %v313_v35, 8.507059e+37 }
 0x2eb   :  { %325 = vrot.lane.b32.xlu1 %v1717_v16, %s1556_s10 }
 0x2ec   :  { %v1368_v26 = vpop.eup %1367 }
 0x2ed   :  { %v305_v27 = vmul.f32 %v1368_v26, %v288_v6  ;;  %v1370_v31 = vpop.eup %1369  ;;  %vm310_vm14 = vweird.f32 %v1368_v26 }
 0x2ee   :  { %v287_v34 = vadd.f32 1.0, %v1370_v31  ;;  %vm311_vm0 = vmor %vm309_vm15, %vm310_vm14  ;;  %vm504_vm15 = vcmp.gt.s32.totalorder %v1703_v51, 2 }
 0x2ef   :  { %v306_v29 = vsub.f32 1.0, %v305_v27 }
 0x2f0   :  { %1371 = vrcp.f32 %v287_v34  ;;  %v300_v47 = vand.u32 2147483648, %v287_v34  ;;  %vm294_vm5 = vweird.f32 %v287_v34  ;;  %v298_v48 = vand.u32 2147483647, %v287_v34 }
 0x2f1   :  { %v307_v30 = vmul.f32 %v1368_v26, %v306_v29 }
 0x2f2   :  { %v301_v50 = vor.u32 1.1754944e-38, %v300_v47  ;;  %vm299_vm7 = vcmp.eq.f32.partialorder %v298_v48, 8.507059e+37  ;;  %v505_v48 = vsel %vm504_vm15, 1, %v1558_v52 }
 0x2f3   :  { %v308_v32 = vadd.f32 %v1368_v26, %v307_v30 }
 0x2f5   :  { %v312_v36 = vsel %vm311_vm0, %v1368_v26, %v308_v32 }
 0x2f6   :  { %v317_v39 = vsel %vm314_vm2, %v316_v37, %v312_v36  ;;  %v1372_v41 = vpop.eup %1371 }
 0x2f7   :  { %v290_v42 = vmul.f32 %v1372_v41, %v287_v34  ;;  %vm295_vm4 = vweird.f32 %v1372_v41 }
 0x2f8   :  { %vm296_vm6 = vmor %vm294_vm5, %vm295_vm4 }
 0x2f9   :  { %v291_v44 = vsub.f32 1.0, %v290_v42 }
 0x2fb   :  { %v292_v45 = vmul.f32 %v1372_v41, %v291_v44 }
 0x2fd   :  { %v293_v46 = vadd.f32 %v1372_v41, %v292_v45 }
 0x2ff   :  { %v297_v49 = vsel %vm296_vm6, %v1372_v41, %v293_v46 }
 0x300   :  { %v302_v54 = vsel %vm299_vm7, %v301_v50, %v297_v49 }
 0x301   :  { %v329_v61 = vmul.f32 %v324_v56, %v302_v54 }
 0x33b   :  { %v336_v38 = vpop.permute.xlu2 %335 }
 0x33c   :  { %v340_v40 = vmul.f32 %v336_v38, %v317_v39 }
 0x33e   :  { %345 = vrot.lane.b32.xlu0 %v340_v40, %s1556_s10 }
 0x346   :  { %366 = vperm.xlu0 %1339, %v364_v43  }
 0x355   :  { %v334_v53 = vpop.permute.xlu1 %333 }
 0x356   :  { %v339_v55 = vmul.f32 %v334_v53, %v302_v54 }
 0x358   :  { %343 = vrot.lane.b32.xlu2 %v339_v55, %s1556_s10 }
 0x35d   :  { %v326_v57 = vpop.permute.xlu1 %325 }
 0x35e   :  { %v330_v58 = vmul.f32 %v326_v57, %v317_v39 }
 0x3b0   :  { %v346_v59 = vpop.permute.xlu0 %345 }
 0x3b1   :  { %v350_v60 = vadd.f32 %v346_v59, %v330_v58 }
 0x3b2   :  { %v344_v62 = vpop.permute.xlu2 %343 }
 0x3b3   :  { %1373 = vtanh.f32 %v350_v60  ;;  %v349_v63 = vadd.f32 %v344_v62, %v329_v61 }
 0x3b5   :  { %1375 = vtanh.f32 %v349_v63  ;;  %v379_v4 = vrot.slane %v349_v63, 1 }
 0x3b7   :  { %v380_v9 = vsel %vm231_vm11, %v350_v60, %v379_v4 }
 0x3b8   :  { %v367_v11 = vpop.permute.xlu0 %366 }
 0x3b9   :  { %v1374_v0 = vpop.eup %1373  ;;  %vm368_vm8 = vcmp.eq.s32.totalorder %v367_v11, 1 }
 0x3ba   :  { %357 = vrot.lane.b32.xlu2 %v1374_v0, %s1557_s8 }
 0x3bb   :  { %v1376_v2 = vpop.eup %1375 }
 0x3bc   :  { %355 = vrot.lane.b32.xlu1 %v1376_v2, %s1557_s8 }
 0x3c2   :  { %381 = vrot.lane.b32.xlu2 %v380_v9, %s1559_s12 }
 0x414   :  { %v358_v10 = vpop.permute.xlu2 %357 }
 0x415   :  { %v362_v20 = vmul.f32 %v358_v10, %v317_v39 }
 0x41c   :  { %v382_v12 = vpop.permute.xlu2 %381 }
 0x41d   :  { %v1747_v13 = vsel %vm368_vm8, %v382_v12, %v1717_v16 }
 0x41e   :  { %v462_v14 = vrot.slane %v1747_v13, 6  ;;  %v463_v27 = vrot.slane %v1747_v13, 7 }
 0x420   :  { %464 = vrot.lane.b32.xlu0 %v462_v14, %s1556_s10 }
 0x42e   :  { %v356_v18 = vpop.permute.xlu1 %355 }
 0x42f   :  { %v361_v19 = vmul.f32 %v356_v18, %v302_v54 }
 0x431   :  { %v371_v22 = vrot.slane %v361_v19, 1 }
 0x433   :  { %v372_v7 = vsel %vm231_vm11, %v362_v20, %v371_v22 }
 0x434   :  { %373 = vrot.lane.b32.xlu1 %v372_v7, %s1556_s10 }
 0x492   :  { %v465_v61 = vpop.permute.xlu0 %464 }
 0x4a6   :  { %v374_v23 = vpop.permute.xlu1 %373 }
 0x4a7   :  { %v1754_v8 = vsel %vm368_vm8, %v374_v23, %v1722_v21  ;;  %v385_v24 = vsel %vm368_vm8, %v374_v23, 0.0 }
 0x4a8   :  { %v387_v25 = vrot.slane %v385_v24, 1  ;;  %389 = vst.msk [vmem:[#allocation2 + $0x1] sm:$0x1] %vm249_vm13, %v385_v24  ;;  %1309 = vmatmul.msk.f32.vlgmr.msrb.gmra.mxu3 %vm116_vm1, %v1754_v8 }
 0x4aa   :  { %390 = vst.msk [vmem:[#allocation2 + $0x9] sm:$0x1] %vm249_vm13, %v387_v25 }
 0x52b   :  { %v411_v16 = vpop.f32.mrf.mxu3 }
 0x52c   :  { %v415_v1 = vrot.slane %v411_v16, 6  ;;  %v416_v3 = vrot.slane %v411_v16, 7 }
 0x52e   :  { %v419_v5 = vadd.f32 %v415_v1, %v1693_v17  ;;  %v420_v6 = vadd.f32 %v416_v3, %v1690_v15 }
 0x530   :  { %1377 = vtanh.f32 %v419_v5  ;;  %v1311_v28 = vmul.f32 -1.442695, %v420_v6  ;;  %v1310_v32 = vmul.f32 -1.442695, %v419_v5 }
 0x531   :  { %1379 = vtanh.f32 %v420_v6 }
 0x532   :  { %1381 = vpow2.f32 %v1311_v28 }
 0x536   :  { %v1378_v21 = vpop.eup %1377 }
 0x537   :  { %v1380_v26 = vpop.eup %1379  ;;  %474 = vrot.lane.b32.xlu1 %v1378_v21, %s1557_s8 }
 0x538   :  { %476 = vrot.lane.b32.xlu2 %v1380_v26, %s1557_s8  ;;  %v1382_v29 = vpop.eup %1381 }
 0x539   :  { %v428_v30 = vadd.f32 1.0, %v1382_v29 }
 0x53b   :  { %1383 = vrcp.f32 %v428_v30  ;;  %v455_v39 = vand.u32 2147483648, %v428_v30  ;;  %vm449_vm10 = vweird.f32 %v428_v30  ;;  %v453_v40 = vand.u32 2147483647, %v428_v30 }
 0x53c   :  { %1385 = vpow2.f32 %v1310_v32 }
 0x53d   :  { %v456_v42 = vor.u32 1.1754944e-38, %v455_v39  ;;  %vm454_vm14 = vcmp.eq.f32.partialorder %v453_v40, 8.507059e+37 }
 0x53f   :  { %466 = vrot.lane.b32.xlu1 %v463_v27, %s1556_s10 }
 0x541   :  { %v1384_v31 = vpop.eup %1383 }
 0x542   :  { %v445_v33 = vmul.f32 %v1384_v31, %v428_v30  ;;  %v1386_v35 = vpop.eup %1385  ;;  %vm450_vm9 = vweird.f32 %v1384_v31 }
 0x543   :  { %v427_v37 = vadd.f32 1.0, %v1386_v35  ;;  %vm451_vm12 = vmor %vm449_vm10, %vm450_vm9 }
 0x544   :  { %v446_v34 = vsub.f32 1.0, %v445_v33 }
 0x545   :  { %1387 = vrcp.f32 %v427_v37  ;;  %v440_v54 = vand.u32 2147483648, %v427_v37  ;;  %vm434_vm2 = vweird.f32 %v427_v37  ;;  %v438_v55 = vand.u32 2147483647, %v427_v37 }
 0x546   :  { %v447_v36 = vmul.f32 %v1384_v31, %v446_v34 }
 0x547   :  { %v441_v57 = vor.u32 1.1754944e-38, %v440_v54  ;;  %vm439_vm4 = vcmp.eq.f32.partialorder %v438_v55, 8.507059e+37 }
 0x548   :  { %v448_v38 = vadd.f32 %v1384_v31, %v447_v36 }
 0x54a   :  { %v452_v41 = vsel %vm451_vm12, %v1384_v31, %v448_v38 }
 0x54b   :  { %v457_v44 = vsel %vm454_vm14, %v456_v42, %v452_v41  ;;  %v1388_v45 = vpop.eup %1387 }
 0x54c   :  { %v430_v47 = vmul.f32 %v1388_v45, %v427_v37  ;;  %vm435_vm0 = vweird.f32 %v1388_v45 }
 0x54d   :  { %vm436_vm3 = vmor %vm434_vm2, %vm435_vm0  ;;  %vm647_vm0 = vcmp.gt.s32.totalorder %v1703_v51, 3 }
 0x54e   :  { %v431_v49 = vsub.f32 1.0, %v430_v47 }
 0x550   :  { %v432_v50 = vmul.f32 %v1388_v45, %v431_v49 }
 0x552   :  { %v433_v53 = vadd.f32 %v1388_v45, %v432_v50 }
 0x554   :  { %v437_v56 = vsel %vm436_vm3, %v1388_v45, %v433_v53 }
 0x555   :  { %v442_v59 = vsel %vm439_vm4, %v441_v57, %v437_v56 }
 0x556   :  { %v470_v63 = vmul.f32 %v465_v61, %v442_v59 }
 0x592   :  { %v477_v43 = vpop.permute.xlu2 %476 }
 0x593   :  { %v481_v46 = vmul.f32 %v477_v43, %v457_v44 }
 0x595   :  { %486 = vrot.lane.b32.xlu0 %v481_v46, %s1556_s10 }
 0x59d   :  { %507 = vperm.xlu0 %1339, %v505_v48  }
 0x5a9   :  { %v475_v58 = vpop.permute.xlu1 %474 }
 0x5aa   :  { %v480_v60 = vmul.f32 %v475_v58, %v442_v59 }
 0x5ac   :  { %484 = vrot.lane.b32.xlu2 %v480_v60, %s1556_s10 }
 0x5b1   :  { %v467_v62 = vpop.permute.xlu1 %466 }
 0x5b2   :  { %v471_v0 = vmul.f32 %v467_v62, %v457_v44 }
 0x606   :  { %v485_v2 = vpop.permute.xlu2 %484 }
 0x607   :  { %v487_v4 = vpop.permute.xlu0 %486  ;;  %v490_v9 = vadd.f32 %v485_v2, %v470_v63 }
 0x608   :  { %v491_v10 = vadd.f32 %v487_v4, %v471_v0 }
 0x609   :  { %1389 = vtanh.f32 %v490_v9  ;;  %v521_v18 = vrot.slane %v490_v9, 2 }
 0x60a   :  { %1391 = vtanh.f32 %v491_v10  ;;  %v522_v14 = vrot.slane %v491_v10, 1 }
 0x60c   :  { %v523_v19 = vsel %vm231_vm11, %v522_v14, %v521_v18  ;;  %v648_v18 = vsel %vm647_vm0, 1, %v1558_v52 }
 0x60f   :  { %v1390_v11 = vpop.eup %1389  ;;  %v508_v22 = vpop.permute.xlu0 %507 }
 0x610   :  { %v1392_v12 = vpop.eup %1391  ;;  %496 = vrot.lane.b32.xlu1 %v1390_v11, %s1557_s8  ;;  %vm509_vm5 = vcmp.eq.s32.totalorder %v508_v22, 1 }
 0x611   :  { %498 = vrot.lane.b32.xlu2 %v1392_v12, %s1557_s8 }
 0x619   :  { %524 = vrot.lane.b32.xlu2 %v523_v19, %s1559_s12 }
 0x66b   :  { %v499_v20 = vpop.permute.xlu2 %498 }
 0x66c   :  { %v503_v25 = vmul.f32 %v499_v20, %v457_v44 }
 0x66e   :  { %v513_v3 = vrot.slane %v503_v25, 1 }
 0x673   :  { %v525_v7 = vpop.permute.xlu2 %524 }
 0x674   :  { %v1775_v23 = vsel %vm509_vm5, %v525_v7, %v1747_v13 }
 0x675   :  { %v605_v24 = vrot.slane %v1775_v23, 5  ;;  %v606_v34 = vrot.slane %v1775_v23, 6 }
 0x677   :  { %607 = vrot.lane.b32.xlu2 %v605_v24, %s1556_s10 }
 0x682   :  { %v497_v16 = vpop.permute.xlu1 %496 }
 0x683   :  { %v502_v1 = vmul.f32 %v497_v16, %v442_v59 }
 0x685   :  { %v512_v5 = vrot.slane %v502_v1, 2 }
 0x687   :  { %v514_v6 = vsel %vm231_vm11, %v513_v3, %v512_v5 }
 0x688   :  { %515 = vrot.lane.b32.xlu1 %v514_v6, %s1556_s10 }
 0x6d1   :  { %v608_v9 = vpop.permute.xlu2 %607 }
 0x6fa   :  { %v516_v21 = vpop.permute.xlu1 %515 }
 0x6fb   :  { %v1782_v26 = vsel %vm509_vm5, %v516_v21, %v1754_v8  ;;  %v528_v27 = vsel %vm509_vm5, %v516_v21, 0.0 }
 0x6fc   :  { %v530_v13 = vrot.slane %v528_v27, 1  ;;  %532 = vst.msk [vmem:[#allocation2 + $0x2] sm:$0x1] %vm249_vm13, %v528_v27  ;;  %1312 = vmatmul.msk.f32.vlgmr.msrb.gmra.mxu1 %vm116_vm1, %v1782_v26 }
 0x6fe   :  { %533 = vst.msk [vmem:[#allocation2 + $0xa] sm:$0x1] %vm249_vm13, %v530_v13 }
 0x779   :  { %v554_v28 = vpop.f32.mrf.mxu1 }
 0x77a   :  { %v558_v29 = vrot.slane %v554_v28, 5  ;;  %v559_v30 = vrot.slane %v554_v28, 6 }
 0x77c   :  { %v562_v31 = vadd.f32 %v558_v29, %v1693_v17  ;;  %v563_v32 = vadd.f32 %v559_v30, %v1690_v15 }
 0x77e   :  { %1393 = vtanh.f32 %v562_v31  ;;  %v1313_v35 = vmul.f32 -1.442695, %v562_v31  ;;  %v1314_v36 = vmul.f32 -1.442695, %v563_v32 }
 0x77f   :  { %1395 = vtanh.f32 %v563_v32 }
 0x780   :  { %1397 = vpow2.f32 %v1313_v35 }
 0x781   :  { %1399 = vpow2.f32 %v1314_v36 }
 0x784   :  { %v1394_v8 = vpop.eup %1393 }
 0x785   :  { %v1396_v33 = vpop.eup %1395  ;;  %617 = vrot.lane.b32.xlu0 %v1394_v8, %s1557_s8 }
 0x786   :  { %619 = vrot.lane.b32.xlu1 %v1396_v33, %s1557_s8  ;;  %v1398_v37 = vpop.eup %1397 }
 0x787   :  { %v1400_v38 = vpop.eup %1399  ;;  %v570_v39 = vadd.f32 1.0, %v1398_v37 }
 0x788   :  { %v571_v40 = vadd.f32 1.0, %v1400_v38 }
 0x789   :  { %1401 = vrcp.f32 %v570_v39  ;;  %v583_v53 = vand.u32 2147483648, %v570_v39  ;;  %vm577_vm8 = vweird.f32 %v570_v39  ;;  %v581_v55 = vand.u32 2147483647, %v570_v39 }
 0x78a   :  { %1403 = vrcp.f32 %v571_v40  ;;  %v598_v54 = vand.u32 2147483648, %v571_v40  ;;  %vm592_vm9 = vweird.f32 %v571_v40  ;;  %v596_v56 = vand.u32 2147483647, %v571_v40 }
 0x78b   :  { %v584_v59 = vor.u32 1.1754944e-38, %v583_v53  ;;  %vm582_vm14 = vcmp.eq.f32.partialorder %v581_v55, 8.507059e+37 }
 0x78c   :  { %v599_v60 = vor.u32 1.1754944e-38, %v598_v54  ;;  %vm597_vm15 = vcmp.eq.f32.partialorder %v596_v56, 8.507059e+37 }
 0x78d   :  { %609 = vrot.lane.b32.xlu0 %v606_v34, %s1556_s10 }
 0x78f   :  { %v1402_v41 = vpop.eup %1401 }
 0x790   :  { %v1404_v42 = vpop.eup %1403  ;;  %v573_v43 = vmul.f32 %v1402_v41, %v570_v39  ;;  %vm578_vm6 = vweird.f32 %v1402_v41 }
 0x791   :  { %v588_v44 = vmul.f32 %v1404_v42, %v571_v40  ;;  %vm593_vm7 = vweird.f32 %v1404_v42  ;;  %vm579_vm10 = vmor %vm577_vm8, %vm578_vm6 }
 0x792   :  { %v574_v45 = vsub.f32 1.0, %v573_v43  ;;  %vm594_vm12 = vmor %vm592_vm9, %vm593_vm7 }
 0x793   :  { %v589_v46 = vsub.f32 1.0, %v588_v44 }
 0x794   :  { %v575_v47 = vmul.f32 %v1402_v41, %v574_v45 }
 0x795   :  { %v590_v48 = vmul.f32 %v1404_v42, %v589_v46 }
 0x796   :  { %v576_v49 = vadd.f32 %v1402_v41, %v575_v47 }
 0x797   :  { %v591_v50 = vadd.f32 %v1404_v42, %v590_v48 }
 0x798   :  { %v580_v57 = vsel %vm579_vm10, %v1402_v41, %v576_v49 }
 0x799   :  { %v595_v58 = vsel %vm594_vm12, %v1404_v42, %v591_v50  ;;  %v585_v62 = vsel %vm582_vm14, %v584_v59, %v580_v57  ;;  %vm790_vm12 = vcmp.gt.s32.totalorder %v1703_v51, 4 }
 0x79a   :  { %v600_v0 = vsel %vm597_vm15, %v599_v60, %v595_v58  ;;  %v613_v20 = vmul.f32 %v608_v9, %v585_v62 }
 0x7f7   :  { %v618_v61 = vpop.permute.xlu0 %617 }
 0x7f8   :  { %v620_v63 = vpop.permute.xlu1 %619  ;;  %v623_v2 = vmul.f32 %v618_v61, %v585_v62 }
 0x7f9   :  { %v624_v4 = vmul.f32 %v620_v63, %v600_v0 }
 0x7fa   :  { %627 = vrot.lane.b32.xlu1 %v623_v2, %s1556_s10 }
 0x7fb   :  { %629 = vrot.lane.b32.xlu2 %v624_v4, %s1556_s10 }
 0x7ff   :  { %v610_v10 = vpop.permute.xlu0 %609 }
 0x800   :  { %v614_v11 = vmul.f32 %v610_v10, %v600_v0 }
 0x803   :  { %650 = vperm.xlu2 %1340, %v648_v18  }
 0x855   :  { %v630_v12 = vpop.permute.xlu2 %629 }
 0x856   :  { %v634_v14 = vadd.f32 %v630_v12, %v614_v11 }
 0x858   :  { %1405 = vtanh.f32 %v634_v14  ;;  %v665_v24 = vrot.slane %v634_v14, 2 }
 0x85d   :  { %v651_v5 = vpop.permute.xlu2 %650 }
 0x85e   :  { %v1406_v19 = vpop.eup %1405  ;;  %vm652_vm2 = vcmp.eq.s32.totalorder %v651_v5, 1 }
 0x85f   :  { %641 = vrot.lane.b32.xlu1 %v1406_v19, %s1557_s8 }
 0x86c   :  { %v628_v22 = vpop.permute.xlu1 %627 }
 0x86d   :  { %v633_v7 = vadd.f32 %v628_v22, %v613_v20  ;;  %v791_v20 = vsel %vm790_vm12, 1, %v1558_v52 }
 0x86f   :  { %1407 = vtanh.f32 %v633_v7  ;;  %v664_v25 = vrot.slane %v633_v7, 3 }
 0x871   :  { %v666_v16 = vsel %vm231_vm11, %v665_v24, %v664_v25 }
 0x872   :  { %667 = vrot.lane.b32.xlu1 %v666_v16, %s1559_s12 }
 0x875   :  { %v1408_v1 = vpop.eup %1407 }
 0x876   :  { %639 = vrot.lane.b32.xlu0 %v1408_v1, %s1557_s8 }
 0x8d1   :  { %v642_v3 = vpop.permute.xlu1 %641 }
 0x8d2   :  { %v646_v13 = vmul.f32 %v642_v3, %v600_v0 }
 0x8d4   :  { %v656_v30 = vrot.slane %v646_v13, 2 }
 0x8e4   :  { %v668_v6 = vpop.permute.xlu1 %667 }
 0x8e5   :  { %v1803_v21 = vsel %vm652_vm2, %v668_v6, %v1775_v23 }
 0x8e6   :  { %v748_v27 = vrot.slane %v1803_v21, 4  ;;  %v749_v41 = vrot.slane %v1803_v21, 5 }
 0x8e8   :  { %750 = vrot.lane.b32.xlu1 %v748_v27, %s1556_s10  ;;  %v640_v28 = vpop.permute.xlu0 %639 }
 0x8e9   :  { %v645_v29 = vmul.f32 %v640_v28, %v585_v62 }
 0x8eb   :  { %v655_v31 = vrot.slane %v645_v29, 3 }
 0x8ed   :  { %v657_v32 = vsel %vm231_vm11, %v656_v30, %v655_v31 }
 0x8ee   :  { %658 = vrot.lane.b32.xlu0 %v657_v32, %s1556_s10 }
 0x95a   :  { %v751_v22 = vpop.permute.xlu1 %750 }
 0x960   :  { %v659_v8 = vpop.permute.xlu0 %658 }
 0x961   :  { %v671_v33 = vsel %vm652_vm2, %v659_v8, 0.0  ;;  %v1810_v34 = vsel %vm652_vm2, %v659_v8, %v1782_v26 }
 0x962   :  { %v673_v23 = vrot.slane %v671_v33, 1  ;;  %675 = vst.msk [vmem:[#allocation2 + $0x3] sm:$0x1] %vm249_vm13, %v671_v33  ;;  %1315 = vmatmul.msk.f32.vlgmr.msra.gmra.mxu2 %vm116_vm1, %v1810_v34 }
 0x964   :  { %676 = vst.msk [vmem:[#allocation2 + $0xb] sm:$0x1] %vm249_vm13, %v673_v23 }
 0x9e5   :  { %v697_v35 = vpop.f32.mrf.mxu2 }
 0x9e6   :  { %v701_v36 = vrot.slane %v697_v35, 4  ;;  %v702_v37 = vrot.slane %v697_v35, 5 }
 0x9e8   :  { %v705_v38 = vadd.f32 %v701_v36, %v1693_v17  ;;  %v706_v39 = vadd.f32 %v702_v37, %v1690_v15 }
 0x9ea   :  { %1409 = vtanh.f32 %v705_v38  ;;  %v1316_v42 = vmul.f32 -1.442695, %v705_v38  ;;  %v1317_v46 = vmul.f32 -1.442695, %v706_v39 }
 0x9eb   :  { %1411 = vtanh.f32 %v706_v39 }
 0x9ec   :  { %1413 = vpow2.f32 %v1316_v42 }
 0x9f0   :  { %v1410_v40 = vpop.eup %1409 }
 0x9f1   :  { %v1412_v26 = vpop.eup %1411  ;;  %760 = vrot.lane.b32.xlu2 %v1410_v40, %s1557_s8 }
 0x9f2   :  { %762 = vrot.lane.b32.xlu0 %v1412_v26, %s1557_s8  ;;  %v1414_v43 = vpop.eup %1413 }
 0x9f3   :  { %v713_v44 = vadd.f32 1.0, %v1414_v43 }
 0x9f5   :  { %1415 = vrcp.f32 %v713_v44  ;;  %v726_v55 = vand.u32 2147483648, %v713_v44  ;;  %vm720_vm4 = vweird.f32 %v713_v44  ;;  %v724_v56 = vand.u32 2147483647, %v713_v44 }
 0x9f6   :  { %1417 = vpow2.f32 %v1317_v46 }
 0x9f7   :  { %v727_v58 = vor.u32 1.1754944e-38, %v726_v55  ;;  %vm725_vm6 = vcmp.eq.f32.partialorder %v724_v56, 8.507059e+37 }
 0x9f9   :  { %752 = vrot.lane.b32.xlu2 %v749_v41, %s1556_s10 }
 0x9fb   :  { %v1416_v45 = vpop.eup %1415 }
 0x9fc   :  { %v716_v47 = vmul.f32 %v1416_v45, %v713_v44  ;;  %v1418_v50 = vpop.eup %1417  ;;  %vm721_vm3 = vweird.f32 %v1416_v45 }
 0x9fd   :  { %v714_v53 = vadd.f32 1.0, %v1418_v50  ;;  %vm722_vm5 = vmor %vm720_vm4, %vm721_vm3  ;;  %vm933_vm4 = vcmp.gt.s32.totalorder %v1703_v51, 5 }
 0x9fe   :  { %v717_v48 = vsub.f32 1.0, %v716_v47 }
 0x9ff   :  { %1419 = vrcp.f32 %v714_v53  ;;  %v741_v9 = vand.u32 2147483648, %v714_v53  ;;  %vm735_vm8 = vweird.f32 %v714_v53  ;;  %v739_v10 = vand.u32 2147483647, %v714_v53 }
 0xa00   :  { %v718_v49 = vmul.f32 %v1416_v45, %v717_v48 }
 0xa01   :  { %v742_v12 = vor.u32 1.1754944e-38, %v741_v9  ;;  %vm740_vm10 = vcmp.eq.f32.partialorder %v739_v10, 8.507059e+37 }
 0xa02   :  { %v719_v54 = vadd.f32 %v1416_v45, %v718_v49 }
 0xa04   :  { %v723_v57 = vsel %vm722_vm5, %v1416_v45, %v719_v54 }
 0xa05   :  { %v728_v60 = vsel %vm725_vm6, %v727_v58, %v723_v57  ;;  %v1420_v62 = vpop.eup %1419 }
 0xa06   :  { %v731_v63 = vmul.f32 %v1420_v62, %v714_v53  ;;  %vm736_vm7 = vweird.f32 %v1420_v62  ;;  %v756_v7 = vmul.f32 %v751_v22, %v728_v60 }
 0xa07   :  { %vm737_vm9 = vmor %vm735_vm8, %vm736_vm7 }
 0xa08   :  { %v732_v0 = vsub.f32 1.0, %v731_v63 }
 0xa0a   :  { %v733_v2 = vmul.f32 %v1420_v62, %v732_v0 }
 0xa0c   :  { %v734_v4 = vadd.f32 %v1420_v62, %v733_v2 }
 0xa0e   :  { %v738_v11 = vsel %vm737_vm9, %v1420_v62, %v734_v4 }
 0xa0f   :  { %v743_v14 = vsel %vm740_vm10, %v742_v12, %v738_v11 }
 0xa4b   :  { %v761_v59 = vpop.permute.xlu2 %760 }
 0xa4c   :  { %v766_v61 = vmul.f32 %v761_v59, %v728_v60 }
 0xa4e   :  { %770 = vrot.lane.b32.xlu0 %v766_v61, %s1556_s10 }
 0xa53   :  { %v753_v1 = vpop.permute.xlu2 %752 }
 0xa54   :  { %v757_v3 = vmul.f32 %v753_v1, %v743_v14 }
 0xa64   :  { %v763_v18 = vpop.permute.xlu0 %762 }
 0xa65   :  { %v767_v19 = vmul.f32 %v763_v18, %v743_v14 }
 0xa67   :  { %772 = vrot.lane.b32.xlu1 %v767_v19, %s1556_s10 }
 0xa6f   :  { %793 = vperm.xlu1 %1338, %v791_v20  }
 0xac0   :  { %v771_v24 = vpop.permute.xlu0 %770 }
 0xac1   :  { %v776_v25 = vadd.f32 %v771_v24, %v756_v7 }
 0xac3   :  { %1421 = vtanh.f32 %v776_v25  ;;  %v807_v28 = vrot.slane %v776_v25, 4 }
 0xac9   :  { %v1422_v16 = vpop.eup %1421 }
 0xaca   :  { %782 = vrot.lane.b32.xlu2 %v1422_v16, %s1557_s8 }
 0xad9   :  { %v773_v5 = vpop.permute.xlu1 %772 }
 0xada   :  { %v777_v6 = vadd.f32 %v773_v5, %v757_v3 }
 0xadc   :  { %1423 = vtanh.f32 %v777_v6  ;;  %v808_v13 = vrot.slane %v777_v6, 3 }
 0xade   :  { %v809_v29 = vsel %vm231_vm11, %v808_v13, %v807_v28 }
 0xae1   :  { %v794_v35 = vpop.permute.xlu1 %793 }
 0xae2   :  { %v1424_v27 = vpop.eup %1423  ;;  %vm795_vm14 = vcmp.eq.s32.totalorder %v794_v35, 1 }
 0xae3   :  { %784 = vrot.lane.b32.xlu0 %v1424_v27, %s1557_s8 }
 0xaeb   :  { %810 = vrot.lane.b32.xlu0 %v809_v29, %s1559_s12 }
 0xb24   :  { %v783_v30 = vpop.permute.xlu2 %782 }
 0xb25   :  { %v788_v31 = vmul.f32 %v783_v30, %v728_v60 }
 0xb27   :  { %v798_v33 = vrot.slane %v788_v31, 4 }
 0xb55   :  { %v785_v32 = vpop.permute.xlu0 %784 }
 0xb56   :  { %v789_v8 = vmul.f32 %v785_v32, %v743_v14  ;;  %v934_v14 = vsel %vm933_vm4, 1, %v1558_v52 }
 0xb58   :  { %v799_v23 = vrot.slane %v789_v8, 3 }
 0xb5a   :  { %v800_v36 = vsel %vm231_vm11, %v799_v23, %v798_v33 }
 0xb5b   :  { %801 = vrot.lane.b32.xlu2 %v800_v36, %s1556_s10 }
 0xb5d   :  { %v811_v37 = vpop.permute.xlu0 %810 }
 0xb5e   :  { %v1833_v38 = vsel %vm795_vm14, %v811_v37, %v1803_v21 }
 0xb5f   :  { %v891_v39 = vrot.slane %v1833_v38, 3  ;;  %v892_v48 = vrot.slane %v1833_v38, 4 }
 0xb61   :  { %893 = vrot.lane.b32.xlu0 %v891_v39, %s1556_s10 }
 0xbb5   :  { %v802_v40 = vpop.permute.xlu2 %801 }
 0xbb6   :  { %v1838_v26 = vsel %vm795_vm14, %v802_v40, %v1810_v34  ;;  %v814_v41 = vsel %vm795_vm14, %v802_v40, 0.0 }
 0xbb7   :  { %v816_v42 = vrot.slane %v814_v41, 1  ;;  %818 = vst.msk [vmem:[#allocation2 + $0x4] sm:$0x1] %vm249_vm13, %v814_v41  ;;  %1318 = vmatmul.msk.f32.vlgmr.msra.gmra.mxu3 %vm116_vm1, %v1838_v26 }
 0xbb9   :  { %819 = vst.msk [vmem:[#allocation2 + $0xc] sm:$0x1] %vm249_vm13, %v816_v42 }
 0xbd3   :  { %v894_v51 = vpop.permute.xlu0 %893 }
 0xc3a   :  { %v840_v43 = vpop.f32.mrf.mxu3 }
 0xc3b   :  { %v844_v21 = vrot.slane %v840_v43, 3  ;;  %v845_v44 = vrot.slane %v840_v43, 4 }
 0xc3d   :  { %v848_v45 = vadd.f32 %v844_v21, %v1693_v17  ;;  %v849_v46 = vadd.f32 %v845_v44, %v1690_v15 }
 0xc3f   :  { %1425 = vtanh.f32 %v848_v45  ;;  %v1320_v49 = vmul.f32 -1.442695, %v849_v46  ;;  %v1319_v55 = vmul.f32 -1.442695, %v848_v45 }
 0xc40   :  { %1427 = vtanh.f32 %v849_v46 }
 0xc41   :  { %1429 = vpow2.f32 %v1320_v49 }
 0xc45   :  { %v1426_v34 = vpop.eup %1425 }
 0xc46   :  { %v1428_v47 = vpop.eup %1427  ;;  %903 = vrot.lane.b32.xlu1 %v1426_v34, %s1557_s8 }
 0xc47   :  { %905 = vrot.lane.b32.xlu2 %v1428_v47, %s1557_s8  ;;  %v1430_v50 = vpop.eup %1429 }
 0xc48   :  { %v857_v53 = vadd.f32 1.0, %v1430_v50 }
 0xc4a   :  { %1431 = vrcp.f32 %v857_v53  ;;  %v884_v62 = vand.u32 2147483648, %v857_v53  ;;  %vm878_vm0 = vweird.f32 %v857_v53  ;;  %v882_v63 = vand.u32 2147483647, %v857_v53 }
 0xc4b   :  { %1433 = vpow2.f32 %v1319_v55 }
 0xc4c   :  { %v885_v2 = vor.u32 1.1754944e-38, %v884_v62  ;;  %vm883_vm3 = vcmp.eq.f32.partialorder %v882_v63, 8.507059e+37 }
 0xc4e   :  { %895 = vrot.lane.b32.xlu1 %v892_v48, %s1556_s10 }
 0xc50   :  { %v1432_v54 = vpop.eup %1431 }
 0xc51   :  { %v874_v56 = vmul.f32 %v1432_v54, %v857_v53  ;;  %v1434_v58 = vpop.eup %1433  ;;  %vm879_vm15 = vweird.f32 %v1432_v54 }
 0xc52   :  { %v856_v60 = vadd.f32 1.0, %v1434_v58  ;;  %vm880_vm2 = vmor %vm878_vm0, %vm879_vm15 }
 0xc53   :  { %v875_v57 = vsub.f32 1.0, %v874_v56 }
 0xc54   :  { %1435 = vrcp.f32 %v856_v60  ;;  %v869_v22 = vand.u32 2147483648, %v856_v60  ;;  %vm863_vm6 = vweird.f32 %v856_v60  ;;  %v867_v7 = vand.u32 2147483647, %v856_v60 }
 0xc55   :  { %v876_v59 = vmul.f32 %v1432_v54, %v875_v57 }
 0xc56   :  { %v870_v25 = vor.u32 1.1754944e-38, %v869_v22  ;;  %vm868_vm8 = vcmp.eq.f32.partialorder %v867_v7, 8.507059e+37 }
 0xc57   :  { %v877_v61 = vadd.f32 %v1432_v54, %v876_v59 }
 0xc59   :  { %v881_v0 = vsel %vm880_vm2, %v1432_v54, %v877_v61 }
 0xc5a   :  { %v886_v9 = vsel %vm883_vm3, %v885_v2, %v881_v0  ;;  %v1436_v10 = vpop.eup %1435 }
 0xc5b   :  { %v859_v12 = vmul.f32 %v1436_v10, %v856_v60  ;;  %vm864_vm5 = vweird.f32 %v1436_v10 }
 0xc5c   :  { %vm865_vm7 = vmor %vm863_vm6, %vm864_vm5 }
 0xc5d   :  { %v860_v18 = vsub.f32 1.0, %v859_v12 }
 0xc5f   :  { %v861_v19 = vmul.f32 %v1436_v10, %v860_v18 }
 0xc61   :  { %v862_v20 = vadd.f32 %v1436_v10, %v861_v19 }
 0xc63   :  { %v866_v24 = vsel %vm865_vm7, %v1436_v10, %v862_v20 }
 0xc64   :  { %v871_v1 = vsel %vm868_vm8, %v870_v25, %v866_v24 }
 0xc65   :  { %v899_v6 = vmul.f32 %v894_v51, %v871_v1 }
 0xca1   :  { %v906_v4 = vpop.permute.xlu2 %905 }
 0xca2   :  { %v910_v11 = vmul.f32 %v906_v4, %v886_v9 }
 0xca4   :  { %915 = vrot.lane.b32.xlu0 %v910_v11, %s1556_s10 }
 0xcac   :  { %936 = vperm.xlu0 %1339, %v934_v14  }
 0xcb8   :  { %v904_v16 = vpop.permute.xlu1 %903 }
 0xcb9   :  { %v909_v3 = vmul.f32 %v904_v16, %v871_v1 }
 0xcbb   :  { %913 = vrot.lane.b32.xlu2 %v909_v3, %s1556_s10 }
 0xcc0   :  { %v896_v5 = vpop.permute.xlu1 %895 }
 0xcc1   :  { %v900_v27 = vmul.f32 %v896_v5, %v886_v9 }
 0xd15   :  { %v914_v13 = vpop.permute.xlu2 %913 }
 0xd16   :  { %v916_v28 = vpop.permute.xlu0 %915  ;;  %v919_v29 = vadd.f32 %v914_v13, %v899_v6 }
 0xd17   :  { %v920_v30 = vadd.f32 %v916_v28, %v900_v27  ;;  %v1883_v28 = vld [vmem:[%s1938_s1] sm:$0x3] }
 0xd18   :  { %1437 = vtanh.f32 %v919_v29  ;;  %v950_v33 = vrot.slane %v919_v29, 5  ;;  %vm1076_vm5 = vcmp.gt.s32.totalorder %v1883_v28, 6 }
 0xd19   :  { %1439 = vtanh.f32 %v920_v30  ;;  %v951_v8 = vrot.slane %v920_v30, 4  ;;  %v1077_v29 = vsel %vm1076_vm5, 1, %v1558_v52 }
 0xd1b   :  { %v952_v23 = vsel %vm231_vm11, %v951_v8, %v950_v33 }
 0xd1e   :  { %v1438_v31 = vpop.eup %1437  ;;  %v937_v36 = vpop.permute.xlu0 %936 }
 0xd1f   :  { %v1440_v32 = vpop.eup %1439  ;;  %925 = vrot.lane.b32.xlu1 %v1438_v31, %s1557_s8  ;;  %vm938_vm9 = vcmp.eq.s32.totalorder %v937_v36, 1 }
 0xd20   :  { %927 = vrot.lane.b32.xlu2 %v1440_v32, %s1557_s8 }
 0xd28   :  { %953 = vrot.lane.b32.xlu2 %v952_v23, %s1559_s12 }
 0xd7a   :  { %v928_v35 = vpop.permute.xlu2 %927 }
 0xd7b   :  { %v932_v41 = vmul.f32 %v928_v35, %v886_v9 }
 0xd7d   :  { %v942_v21 = vrot.slane %v932_v41, 4 }
 0xd82   :  { %v954_v37 = vpop.permute.xlu2 %953 }
 0xd83   :  { %v1859_v39 = vsel %vm938_vm9, %v954_v37, %v1833_v38 }
 0xd84   :  { %v1034_v40 = vrot.slane %v1859_v39, 2  ;;  %v1035_v56 = vrot.slane %v1859_v39, 3 }
 0xd86   :  { %1036 = vrot.lane.b32.xlu2 %v1034_v40, %s1556_s10 }
 0xd91   :  { %v926_v42 = vpop.permute.xlu1 %925 }
 0xd92   :  { %v931_v43 = vmul.f32 %v926_v42, %v871_v1 }
 0xd94   :  { %v941_v44 = vrot.slane %v931_v43, 5 }
 0xd96   :  { %v943_v45 = vsel %vm231_vm11, %v942_v21, %v941_v44 }
 0xd97   :  { %944 = vrot.lane.b32.xlu1 %v943_v45, %s1556_s10 }
 0xde0   :  { %v1037_v30 = vpop.permute.xlu2 %1036 }
 0xe09   :  { %v945_v46 = vpop.permute.xlu1 %944 }
 0xe0a   :  { %v1866_v34 = vsel %vm938_vm9, %v945_v46, %v1838_v26  ;;  %v957_v47 = vsel %vm938_vm9, %v945_v46, 0.0 }
 0xe0b   :  { %v959_v38 = vrot.slane %v957_v47, 1  ;;  %961 = vst.msk [vmem:[#allocation2 + $0x5] sm:$0x1] %vm249_vm13, %v957_v47  ;;  %1321 = vmatmul.msk.f32.vlgmr.msrb.gmra.mxu0 %vm116_vm1, %v1866_v34 }
 0xe0d   :  { %962 = vst.msk [vmem:[#allocation2 + $0xd] sm:$0x1] %vm249_vm13, %v959_v38 }
 0xe88   :  { %v983_v48 = vpop.f32.mrf.mxu0 }
 0xe89   :  { %v987_v49 = vrot.slane %v983_v48, 2  ;;  %v988_v50 = vrot.slane %v983_v48, 3 }
 0xe8b   :  { %v991_v53 = vadd.f32 %v987_v49, %v1693_v17  ;;  %v992_v54 = vadd.f32 %v988_v50, %v1690_v15 }
 0xe8d   :  { %1441 = vtanh.f32 %v991_v53  ;;  %v1322_v57 = vmul.f32 -1.442695, %v991_v53  ;;  %v1323_v58 = vmul.f32 -1.442695, %v992_v54 }
 0xe8e   :  { %1443 = vtanh.f32 %v992_v54 }
 0xe8f   :  { %1445 = vpow2.f32 %v1322_v57 }
 0xe90   :  { %1447 = vpow2.f32 %v1323_v58 }
 0xe93   :  { %v1442_v26 = vpop.eup %1441 }
 0xe94   :  { %v1444_v55 = vpop.eup %1443  ;;  %1046 = vrot.lane.b32.xlu0 %v1442_v26, %s1557_s8 }
 0xe95   :  { %1048 = vrot.lane.b32.xlu1 %v1444_v55, %s1557_s8  ;;  %v1446_v59 = vpop.eup %1445 }
 0xe96   :  { %v1448_v60 = vpop.eup %1447  ;;  %v999_v61 = vadd.f32 1.0, %v1446_v59 }
 0xe97   :  { %v1000_v62 = vadd.f32 1.0, %v1448_v60 }
 0xe98   :  { %1449 = vrcp.f32 %v999_v61  ;;  %v1012_v19 = vand.u32 2147483648, %v999_v61  ;;  %vm1006_vm14 = vweird.f32 %v999_v61  ;;  %v1010_v22 = vand.u32 2147483647, %v999_v61 }
 0xe99   :  { %1451 = vrcp.f32 %v1000_v62  ;;  %v1027_v20 = vand.u32 2147483648, %v1000_v62  ;;  %vm1021_vm15 = vweird.f32 %v1000_v62  ;;  %v1025_v7 = vand.u32 2147483647, %v1000_v62 }
 0xe9a   :  { %v1013_v16 = vor.u32 1.1754944e-38, %v1012_v19  ;;  %vm1011_vm3 = vcmp.eq.f32.partialorder %v1010_v22, 8.507059e+37 }
 0xe9b   :  { %v1028_v1 = vor.u32 1.1754944e-38, %v1027_v20  ;;  %vm1026_vm4 = vcmp.eq.f32.partialorder %v1025_v7, 8.507059e+37 }
 0xe9c   :  { %1038 = vrot.lane.b32.xlu0 %v1035_v56, %s1556_s10 }
 0xe9e   :  { %v1450_v63 = vpop.eup %1449 }
 0xe9f   :  { %v1452_v0 = vpop.eup %1451  ;;  %v1002_v2 = vmul.f32 %v1450_v63, %v999_v61  ;;  %vm1007_vm10 = vweird.f32 %v1450_v63 }
 0xea0   :  { %v1017_v4 = vmul.f32 %v1452_v0, %v1000_v62  ;;  %vm1022_vm12 = vweird.f32 %v1452_v0  ;;  %vm1008_vm0 = vmor %vm1006_vm14, %vm1007_vm10 }
 0xea1   :  { %v1003_v9 = vsub.f32 1.0, %v1002_v2  ;;  %vm1023_vm2 = vmor %vm1021_vm15, %vm1022_vm12 }
 0xea2   :  { %v1018_v10 = vsub.f32 1.0, %v1017_v4 }
 0xea3   :  { %v1004_v11 = vmul.f32 %v1450_v63, %v1003_v9 }
 0xea4   :  { %v1019_v12 = vmul.f32 %v1452_v0, %v1018_v10 }
 0xea5   :  { %v1005_v14 = vadd.f32 %v1450_v63, %v1004_v11 }
 0xea6   :  { %v1020_v18 = vadd.f32 %v1452_v0, %v1019_v12 }
 0xea7   :  { %v1009_v24 = vsel %vm1008_vm0, %v1450_v63, %v1005_v14 }
 0xea8   :  { %v1024_v25 = vsel %vm1023_vm2, %v1452_v0, %v1020_v18  ;;  %v1014_v51 = vsel %vm1011_vm3, %v1013_v16, %v1009_v24  ;;  %vm1219_vm2 = vcmp.gt.s32.totalorder %v1883_v28, 7  ;;  %vm1278_vm3 = vcmask 64512  }
 0xea9   :  { %v1029_v6 = vsel %vm1026_vm4, %v1028_v1, %v1024_v25  ;;  %v1042_v35 = vmul.f32 %v1037_v30, %v1014_v51 }
 0xf06   :  { %v1047_v3 = vpop.permute.xlu0 %1046 }
 0xf07   :  { %v1049_v5 = vpop.permute.xlu1 %1048  ;;  %v1052_v27 = vmul.f32 %v1047_v3, %v1014_v51 }
 0xf08   :  { %v1053_v13 = vmul.f32 %v1049_v5, %v1029_v6 }
 0xf09   :  { %1056 = vrot.lane.b32.xlu1 %v1052_v27, %s1556_s10 }
 0xf0a   :  { %1058 = vrot.lane.b32.xlu2 %v1053_v13, %s1556_s10 }
 0xf0e   :  { %v1039_v31 = vpop.permute.xlu0 %1038 }
 0xf0f   :  { %v1043_v32 = vmul.f32 %v1039_v31, %v1029_v6 }
 0xf12   :  { %1079 = vperm.xlu2 %1340, %v1077_v29  }
 0xf64   :  { %v1059_v8 = vpop.permute.xlu2 %1058 }
 0xf65   :  { %v1063_v33 = vadd.f32 %v1059_v8, %v1043_v32 }
 0xf67   :  { %1453 = vtanh.f32 %v1063_v33  ;;  %v1094_v40 = vrot.slane %v1063_v33, 5  ;;  %v1220_v33 = vsel %vm1219_vm2, 1, %v1558_v52 }
 0xf6c   :  { %v1080_v44 = vpop.permute.xlu2 %1079 }
 0xf6d   :  { %v1454_v23 = vpop.eup %1453  ;;  %vm1081_vm6 = vcmp.eq.s32.totalorder %v1080_v44, 1 }
 0xf6e   :  { %1070 = vrot.lane.b32.xlu1 %v1454_v23, %s1557_s8 }
 0xf7b   :  { %v1057_v36 = vpop.permute.xlu1 %1056 }
 0xf7c   :  { %v1062_v37 = vadd.f32 %v1057_v36, %v1042_v35 }
 0xf7e   :  { %1455 = vtanh.f32 %v1062_v37  ;;  %v1093_v41 = vrot.slane %v1062_v37, 6 }
 0xf80   :  { %v1095_v42 = vsel %vm231_vm11, %v1094_v40, %v1093_v41 }
 0xf81   :  { %1096 = vrot.lane.b32.xlu1 %v1095_v42, %s1559_s12 }
 0xf84   :  { %v1456_v43 = vpop.eup %1455 }
 0xf85   :  { %1068 = vrot.lane.b32.xlu0 %v1456_v43, %s1557_s8 }
 0xfe0   :  { %v1071_v21 = vpop.permute.xlu1 %1070 }
 0xfe1   :  { %v1075_v38 = vmul.f32 %v1071_v21, %v1029_v6 }
 0xfe3   :  { %v1085_v50 = vrot.slane %v1075_v38, 5 }
 0xff3   :  { %v1097_v45 = vpop.permute.xlu1 %1096 }
 0xff4   :  { %v1099_v46 = vsel %vm1081_vm6, %v1097_v45, %v1859_v39 }
 0xff5   :  { %v1177_v47 = vrot.slane %v1099_v46, 1 }
 0xff7   :  { %1179 = vrot.lane.b32.xlu1 %v1177_v47, %s1556_s10  ;;  %v1069_v48 = vpop.permute.xlu0 %1068 }
 0xff8   :  { %v1074_v49 = vmul.f32 %v1069_v48, %v1014_v51 }
 0xffa   :  { %v1084_v53 = vrot.slane %v1074_v49, 6  ;;  %v1244_v49 = vld [vmem:[%s1942_s5 + $0x18] sm:$0xff] }
 0xffb   :  { %1267 = vmatpush.msrb.mxu2 %v1244_v49 }
 0xffc   :  { %v1086_v54 = vsel %vm231_vm11, %v1085_v50, %v1084_v53  ;;  %v1243_v50 = vld [vmem:[%s1942_s5 + $0x10] sm:$0xff]  ;;  %v1242_v53 = vld [vmem:[%s1942_s5 + $0x8] sm:$0xff] }
 0xffd   :  { %1087 = vrot.lane.b32.xlu0 %v1086_v54, %s1556_s10  ;;  %1268 = vmatpush.msrb.mxu2 %v1243_v50  ;;  %v1241_v54 = vld [vmem:[%s1942_s5] sm:$0xff]  ;;  %s1560_s5 = smov [#allocation8]  }
 0xffe   :  { %s1285_s24 = sshll.u32 %s1560_s5, 4  ;;  %s1286_s24 = int_to_ptr.vmem [resolvable:$true] %s1285_s24 }
 0xfff   :  { %1269 = vmatpush.msrb.mxu2 %v1242_v53 }
0x1001   :  { %1270 = vmatpush.msrb.mxu2 %v1241_v54 }
0x1069   :  { %v1180_v23 = vpop.permute.xlu1 %1179 }
0x106f   :  { %v1088_v26 = vpop.permute.xlu0 %1087 }
0x1070   :  { %v1090_v55 = vsel %vm1081_vm6, %v1088_v26, %v1866_v34  ;;  %v1100_v56 = vsel %vm1081_vm6, %v1088_v26, 0.0  ;;  %v1178_v34 = vrot.slane %v1099_v46, 2 }
0x1071   :  { %v1102_v57 = vrot.slane %v1100_v56, 1  ;;  %1104 = vst.msk [vmem:[#allocation2 + $0x6] sm:$0x1] %vm249_vm13, %v1100_v56  ;;  %1324 = vmatmul.msk.f32.vlgmr.msra.gmra.mxu1 %vm116_vm1, %v1090_v55 }
0x1073   :  { %1105 = vst.msk [vmem:[#allocation2 + $0xe] sm:$0x1] %vm249_vm13, %v1102_v57 }
0x10ee   :  { %v1126_v39 = vpop.f32.mrf.mxu1 }
0x10ef   :  { %v1130_v58 = vrot.slane %v1126_v39, 1  ;;  %v1131_v59 = vrot.slane %v1126_v39, 2 }
0x10f1   :  { %v1134_v60 = vadd.f32 %v1130_v58, %v1693_v17  ;;  %v1135_v61 = vadd.f32 %v1131_v59, %v1690_v15  ;;  %v1344_v59 = vld [vmem:[%s1943_s6] ss:$0 sm:$0xff] }
0x10f3   :  { %1457 = vtanh.f32 %v1134_v60  ;;  %v1325_v0 = vmul.f32 -1.442695, %v1134_v60  ;;  %v1326_v17 = vmul.f32 -1.442695, %v1135_v61 }
0x10f4   :  { %1459 = vtanh.f32 %v1135_v61 }
0x10f5   :  { %1461 = vpow2.f32 %v1325_v0 }
0x10f9   :  { %v1458_v62 = vpop.eup %1457 }
0x10fa   :  { %v1460_v63 = vpop.eup %1459  ;;  %1189 = vrot.lane.b32.xlu2 %v1458_v62, %s1557_s8 }
0x10fb   :  { %1191 = vrot.lane.b32.xlu0 %v1460_v63, %s1557_s8  ;;  %v1462_v2 = vpop.eup %1461 }
0x10fc   :  { %v1142_v4 = vadd.f32 1.0, %v1462_v2 }
0x10fe   :  { %1463 = vrcp.f32 %v1142_v4  ;;  %v1155_v19 = vand.u32 2147483648, %v1142_v4  ;;  %vm1149_vm8 = vweird.f32 %v1142_v4  ;;  %v1153_v20 = vand.u32 2147483647, %v1142_v4 }
0x10ff   :  { %1465 = vpow2.f32 %v1326_v17 }
0x1100   :  { %v1156_v7 = vor.u32 1.1754944e-38, %v1155_v19  ;;  %vm1154_vm10 = vcmp.eq.f32.partialorder %v1153_v20, 8.507059e+37 }
0x1102   :  { %1181 = vrot.lane.b32.xlu2 %v1178_v34, %s1556_s10 }
0x1104   :  { %v1464_v9 = vpop.eup %1463 }
0x1105   :  { %v1145_v10 = vmul.f32 %v1464_v9, %v1142_v4  ;;  %v1466_v12 = vpop.eup %1465  ;;  %vm1150_vm7 = vweird.f32 %v1464_v9 }
0x1106   :  { %v1143_v14 = vadd.f32 1.0, %v1466_v12  ;;  %vm1151_vm9 = vmor %vm1149_vm8, %vm1150_vm7 }
0x1107   :  { %v1146_v15 = vsub.f32 1.0, %v1145_v10 }
0x1108   :  { %1467 = vrcp.f32 %v1143_v14  ;;  %v1170_v27 = vand.u32 2147483648, %v1143_v14  ;;  %vm1164_vm14 = vweird.f32 %v1143_v14  ;;  %v1168_v13 = vand.u32 2147483647, %v1143_v14 }
0x1109   :  { %v1147_v11 = vmul.f32 %v1464_v9, %v1146_v15 }
0x110a   :  { %v1171_v30 = vor.u32 1.1754944e-38, %v1170_v27  ;;  %vm1169_vm0 = vcmp.eq.f32.partialorder %v1168_v13, 8.507059e+37 }
0x110b   :  { %v1148_v18 = vadd.f32 %v1464_v9, %v1147_v11 }
0x110d   :  { %v1152_v22 = vsel %vm1151_vm9, %v1464_v9, %v1148_v18 }
0x110e   :  { %v1157_v25 = vsel %vm1154_vm10, %v1156_v7, %v1152_v22  ;;  %v1468_v1 = vpop.eup %1467 }
0x110f   :  { %v1160_v3 = vmul.f32 %v1468_v1, %v1143_v14  ;;  %vm1165_vm12 = vweird.f32 %v1468_v1  ;;  %v1185_v35 = vmul.f32 %v1180_v23, %v1157_v25 }
0x1110   :  { %vm1166_vm15 = vmor %vm1164_vm14, %vm1165_vm12 }
0x1111   :  { %v1161_v51 = vsub.f32 1.0, %v1160_v3 }
0x1113   :  { %v1162_v5 = vmul.f32 %v1468_v1, %v1161_v51 }
0x1115   :  { %v1163_v6 = vadd.f32 %v1468_v1, %v1162_v5 }
0x1117   :  { %v1167_v29 = vsel %vm1166_vm15, %v1468_v1, %v1163_v6 }
0x1118   :  { %v1172_v31 = vsel %vm1169_vm0, %v1171_v30, %v1167_v29 }
0x1154   :  { %v1190_v24 = vpop.permute.xlu2 %1189 }
0x1155   :  { %v1195_v16 = vmul.f32 %v1190_v24, %v1157_v25 }
0x1157   :  { %1199 = vrot.lane.b32.xlu0 %v1195_v16, %s1556_s10 }
0x115c   :  { %v1182_v41 = vpop.permute.xlu2 %1181 }
0x115d   :  { %v1186_v42 = vmul.f32 %v1182_v41, %v1172_v31 }
0x116d   :  { %v1192_v32 = vpop.permute.xlu0 %1191 }
0x116e   :  { %v1196_v8 = vmul.f32 %v1192_v32, %v1172_v31 }
0x1170   :  { %1201 = vrot.lane.b32.xlu1 %v1196_v8, %s1556_s10 }
0x1178   :  { %1222 = vperm.xlu1 %1338, %v1220_v33  }
0x11c9   :  { %v1200_v36 = vpop.permute.xlu0 %1199 }
0x11ca   :  { %v1205_v37 = vadd.f32 %v1200_v36, %v1185_v35 }
0x11cc   :  { %1469 = vtanh.f32 %v1205_v37 }
0x11d2   :  { %v1470_v40 = vpop.eup %1469 }
0x11d3   :  { %1211 = vrot.lane.b32.xlu2 %v1470_v40, %s1557_s8 }
0x11e2   :  { %v1202_v43 = vpop.permute.xlu1 %1201 }
0x11e3   :  { %v1206_v21 = vadd.f32 %v1202_v43, %v1186_v42 }
0x11e5   :  { %1471 = vtanh.f32 %v1206_v21 }
0x11ea   :  { %v1223_v26 = vpop.permute.xlu1 %1222 }
0x11eb   :  { %v1472_v44 = vpop.eup %1471 }
0x11ec   :  { %1213 = vrot.lane.b32.xlu0 %v1472_v44, %s1557_s8 }
0x122d   :  { %v1212_v28 = vpop.permute.xlu2 %1211 }
0x122e   :  { %v1217_v45 = vmul.f32 %v1212_v28, %v1157_v25 }
0x1230   :  { %v1227_v47 = vrot.slane %v1217_v45, 7 }
0x125e   :  { %v1214_v52 = vpop.permute.xlu0 %1213 }
0x125f   :  { %v1218_v46 = vmul.f32 %v1214_v52, %v1172_v31 }
0x1261   :  { %v1228_v38 = vrot.slane %v1218_v46, 6 }
0x1263   :  { %v1229_v48 = vsel %vm231_vm11, %v1228_v38, %v1227_v47  ;;  %vm1224_vm11 = vcmp.eq.s32.totalorder %v1223_v26, 1 }
0x1264   :  { %1230 = vrot.lane.b32.xlu2 %v1229_v48, %s1556_s10 }
0x12be   :  { %v1231_v55 = vpop.permute.xlu2 %1230 }
0x12bf   :  { %v1233_v56 = vsel %vm1224_vm11, %v1231_v55, 0.0 }
0x12c0   :  { %v1235_v57 = vrot.slane %v1233_v56, 1  ;;  %1237 = vst.msk [vmem:[#allocation2 + $0x7] sm:$0x1] %vm249_vm13, %v1233_v56 }
0x12c2   :  { %1238 = vst.msk [vmem:[#allocation2 + $0xf] sm:$0x1] %vm249_vm13, %v1235_v57 }
0x12c7   :  { %v1239_v39 = vld [vmem:[#allocation2] sm:$0xff] }
0x12c8   :  { %1327 = vmatmul.msk.f32.vlgmr.msrb.gmra.mxu2 %vm116_vm1, %v1239_v39 }
0x12c9   :  { %v1240_v58 = vld [vmem:[#allocation2 + $0x8] sm:$0xff] }
0x12d0   :  { %1328 = vmatmul.msk.f32.gmra.mxu2 %vm116_vm1, %v1240_v58 }
0x134b   :  { %v1272_v60 = vpop.f32.mrf.mxu2 }
0x134c   :  { %v1273_v61 = vadd.f32 %v1344_v59, %v1272_v60 }
0x134e   :  { %1279 = vst.msk [vmem:[#allocation8] sm:$0xff] %vm1278_vm3, %v1273_v61 }
0x1353   :  { %v1275_v62 = vpop.f32.mrf.mxu2 }
0x1354   :  { %v1276_v63 = vadd.f32 %v1344_v59, %v1275_v62 }
0x1356   :  { %1280 = vst.msk [vmem:[#allocation8 + $0x8] sm:$0xff] %vm1278_vm3, %v1276_v63 }
0x1357   :  { %1293 = dma.vmem_to_hbm [thread:$0]  %s1286_s24, 256, %s1288_s27, [#allocation5], %s1553_s17, %s1553_s17, %s1554_s18  }
0x1358   :  { %1550 = dma.done.wait [#allocation5], 256  }
0x1359   :  { %1551 = vsyncadd [#allocation5], 4294967040 }
0x135a   :  { %1298 = vsyncpa [#allocation4], 1 }
0x135b   :  { %1299 = vsyncpa [#allocation7], 1 }
0x135c   :  { %1300 = vsyncpa [#allocation5], 1 }

</bundles_post_ra>
